<compile_context>
chip_gen: v7x
topology: tpu7x:2x2x1
jax: 0.10.0
libtpu: 0.0.40
codegen_flags: <defaults>
</compile_context>

<pallas_src>
import jax
import jax.numpy as jnp
from jax.experimental import pallas as pl
from jax.experimental.pallas import tpu as pltpu

# Constants mirroring the PyTorch module defaults (small & deterministic)
HIDDEN_LAYERS = (64, 32)
DROPOUT = 0.0            # F.dropout is stochastic; with p=0 the `if self.dropout:` branch is skipped
EMBEDDINGS_SIZE = 32
VOCAB_SIZE = 64
N_LABELS = 4
LANE_PAD = 128           # lane-dense padded output width


def mlp_kernel(tok_ref,                 # VMEM (TB, S) int32
               ew1_ref, b1_ref,         # VMEM (V, H1), (1, H1)   (emb @ w1 folded)
               w2_ref, b2_ref,          # VMEM (H1, H2), (1, H2)
               wo_ref, bo_ref,          # VMEM (H2, LP), (1, LP)  (lane-padded)
               out_ref):                # VMEM (TB, LP)
    TB, S = tok_ref.shape
    V = ew1_ref.shape[0]

    tok = tok_ref[...]                                            # (TB, S) int32, one load

    # --- embedding lookup + mean over seq as a count matmul ------------------
    # counts(b, v) = (1/S) * #{s : tok[b, s] == v}.  S is tiny/static, so the
    # count build is a few fully register-resident VPU compares/adds.
    # Note: ids outside [0, V) contribute zero (jnp.take would clamp; PyTorch
    # nn.Embedding would error) — only differs for invalid inputs.
    vocab_iota = jax.lax.broadcasted_iota(jnp.int32, (TB, V), 1)  # (TB, V)
    counts = jnp.zeros((TB, V), jnp.float32)
    for s in range(S):                                            # unrolled, S=8
        counts = counts + jnp.where(tok[:, s:s + 1] == vocab_iota, 1.0, 0.0)
    counts = counts * (1.0 / S)                                   # fold the mean

    # --- hidden layers: relu(x @ W + b) ---------------------------------------
    # First layer fused with the embedding matmul: (counts @ emb) @ w1 == counts @ (emb @ w1).
    h = jnp.maximum(
        jnp.dot(counts, ew1_ref[...], preferred_element_type=jnp.float32) + b1_ref[...], 0.0)
    h = jnp.maximum(
        jnp.dot(h, w2_ref[...], preferred_element_type=jnp.float32) + b2_ref[...], 0.0)
    # TODO(synk): training-mode stochastic F.dropout omitted (DROPOUT = 0.0 here).

    # --- output projection (lane-dense store; padded cols are zero) -----------
    out_ref[...] = (
        jnp.dot(h, wo_ref[...], preferred_element_type=jnp.float32) + bo_ref[...])


def mlp_classifier_forward(token_ids, emb, w1, b1, w2, b2, wo, bo, *, batch_tile=128):
    B, S = token_ids.shape
    V, D = emb.shape
    H1 = w1.shape[1]
    H2 = w2.shape[1]
    L = wo.shape[1]
    LP = LANE_PAD

    # Fold the (linear) mean-pool + embedding matmul into the first Linear.
    ew1 = jnp.dot(emb, w1, preferred_element_type=jnp.float32)    # (V, H1)

    # Lane-dense output: pad the output projection to 128 lanes (zeros), slice after.
    wo_p = jnp.zeros((H2, LP), wo.dtype).at[:, :L].set(wo)
    bo_p = jnp.zeros((1, LP), bo.dtype).at[:, :L].set(bo)

    # Batch tile: full batch if small, otherwise a sublane-aligned tile.
    if B <= batch_tile:
        TB = B                                    # full-dim block is always legal
    else:
        TB = max(8, (batch_tile // 8) * 8)        # keep a multiple of 8 sublanes
    grid = (pl.cdiv(B, TB),)

    out_padded = pl.pallas_call(
        mlp_kernel,
        out_shape=jax.ShapeDtypeStruct((B, LP), jnp.float32),
        grid=grid,
        in_specs=[
            pl.BlockSpec((TB, S), lambda i: (i, 0)),     # token ids, tiled over batch
            pl.BlockSpec((V, H1), lambda i: (0, 0)),     # folded emb@w1 (replicated)
            pl.BlockSpec((1, H1), lambda i: (0, 0)),
            pl.BlockSpec((H1, H2), lambda i: (0, 0)),
            pl.BlockSpec((1, H2), lambda i: (0, 0)),
            pl.BlockSpec((H2, LP), lambda i: (0, 0)),
            pl.BlockSpec((1, LP), lambda i: (0, 0)),
        ],
        out_specs=pl.BlockSpec((TB, LP), lambda i: (i, 0)),
        compiler_params=pltpu.CompilerParams(
            dimension_semantics=("parallel",)),          # batch axis -> megacore on v7x
    )(token_ids, ew1, b1, w2, b2, wo_p, bo_p)

    return out_padded[:, :L]


def reference_forward(token_ids, emb, w1, b1, w2, b2, wo, bo):
    x = jnp.take(emb, token_ids, axis=0)          # (B, S, D)
    x = jnp.mean(x, axis=1)                       # (B, D)
    x = jnp.maximum(x @ w1 + b1, 0.0)
    x = jnp.maximum(x @ w2 + b2, 0.0)
    return x @ wo + bo


if __name__ == "__main__":
    # Small deterministic shapes; B chosen so the grid has 2 steps (TB=128),
    # exercising both the large batch tile and the v7x two-TensorCore split.
    B, S = 256, 8
    V, D = VOCAB_SIZE, EMBEDDINGS_SIZE
    H1, H2 = HIDDEN_LAYERS
    L = N_LABELS

    key = jax.random.PRNGKey(0)
    k_emb, k_w1, k_b1, k_w2, k_b2, k_wo, k_bo, k_idx = jax.random.split(key, 8)

    # Embedding matrix: random, row 0 forced to zero (padding_idx=0)
    emb = jax.random.normal(k_emb, (V, D), jnp.float32)
    emb = emb.at[0].set(0.0)

    # Linear params (stored as (in, out); equivalent to nn.Linear weight.T)
    w1 = jax.random.normal(k_w1, (D, H1), jnp.float32) * 0.1
    b1 = jax.random.normal(k_b1, (1, H1), jnp.float32) * 0.1
    w2 = jax.random.normal(k_w2, (H1, H2), jnp.float32) * 0.1
    b2 = jax.random.normal(k_b2, (1, H2), jnp.float32) * 0.1
    wo = jax.random.normal(k_wo, (H2, L), jnp.float32) * 0.1
    bo = jax.random.normal(k_bo, (1, L), jnp.float32) * 0.1

    token_ids = jax.random.randint(k_idx, (B, S), 0, V, jnp.int32)

    out = mlp_classifier_forward(token_ids, emb, w1, b1, w2, b2, wo, bo)
    out = jax.block_until_ready(out)

    ref = reference_forward(token_ids, emb, w1, b1, w2, b2, wo, bo)
    assert out.shape == (B, L)
    assert jnp.allclose(out, ref, atol=1e-3, rtol=1e-3), "mismatch vs. JAX reference"

    print("KERNEL_OK")
</pallas_src>

<mosaic_0001>
module attributes {stable_mosaic.version = 11 : i64} {
  func.func @mlp_kernel(%arg0: i32, %arg1: memref<128x8xi32, #tpu.memory_space<vmem>>, %arg2: memref<64x64xf32, #tpu.memory_space<vmem>>, %arg3: memref<1x64xf32, #tpu.memory_space<vmem>>, %arg4: memref<64x32xf32, #tpu.memory_space<vmem>>, %arg5: memref<1x32xf32, #tpu.memory_space<vmem>>, %arg6: memref<32x128xf32, #tpu.memory_space<vmem>>, %arg7: memref<1x128xf32, #tpu.memory_space<vmem>>, %arg8: memref<128x128xf32, #tpu.memory_space<vmem>>) attributes {dimension_semantics = [#tpu.dimension_semantics<parallel>], iteration_bounds = array<i64: 2>, scalar_prefetch = 0 : i64, scratch_operands = 0 : i64, tpu.core_type = #tpu.core_type<tc>, window_params = [{transform_indices = @transform_0, window_bounds = array<i64: 128, 8>}, {pipeline_mode = #tpu.pipeline_mode<synchronous>, transform_indices = @transform_1, window_bounds = array<i64: 64, 64>}, {pipeline_mode = #tpu.pipeline_mode<synchronous>, transform_indices = @transform_2, window_bounds = array<i64: 1, 64>}, {pipeline_mode = #tpu.pipeline_mode<synchronous>, transform_indices = @transform_3, window_bounds = array<i64: 64, 32>}, {pipeline_mode = #tpu.pipeline_mode<synchronous>, transform_indices = @transform_4, window_bounds = array<i64: 1, 32>}, {pipeline_mode = #tpu.pipeline_mode<synchronous>, transform_indices = @transform_5, window_bounds = array<i64: 32, 128>}, {pipeline_mode = #tpu.pipeline_mode<synchronous>, transform_indices = @transform_6, window_bounds = array<i64: 1, 128>}, {transform_indices = @transform_7, window_bounds = array<i64: 128, 128>}]} {
    %c0 = arith.constant 0 : index
    %c0_0 = arith.constant 0 : index
    %0 = vector.load %arg1[%c0, %c0_0] : memref<128x8xi32, #tpu.memory_space<vmem>>, vector<128x8xi32>
    %1 = tpu.iota {dimensions = array<i32: 1>} : vector<128x64xi32>
    %cst = arith.constant 0.000000e+00 : f32
    %2 = vector.broadcast %cst : f32 to vector<128x64xf32>
    %3 = vector.extract_strided_slice %0 {offsets = [0, 0], sizes = [128, 1], strides = [1, 1]} : vector<128x8xi32> to vector<128x1xi32>
    %4 = vector.broadcast %3 : vector<128x1xi32> to vector<128x64xi32>
    %5 = arith.cmpi eq, %4, %1 : vector<128x64xi32>
    %cst_1 = arith.constant 1.000000e+00 : f32
    %cst_2 = arith.constant 0.000000e+00 : f32
    %6 = vector.broadcast %cst_1 : f32 to vector<128x64xf32>
    %7 = vector.broadcast %cst_2 : f32 to vector<128x64xf32>
    %8 = arith.select %5, %6, %7 : vector<128x64xi1>, vector<128x64xf32>
    %9 = arith.addf %2, %8 : vector<128x64xf32>
    %10 = vector.extract_strided_slice %0 {offsets = [0, 1], sizes = [128, 1], strides = [1, 1]} : vector<128x8xi32> to vector<128x1xi32>
    %11 = vector.broadcast %10 : vector<128x1xi32> to vector<128x64xi32>
    %12 = arith.cmpi eq, %11, %1 : vector<128x64xi32>
    %cst_3 = arith.constant 1.000000e+00 : f32
    %cst_4 = arith.constant 0.000000e+00 : f32
    %13 = vector.broadcast %cst_3 : f32 to vector<128x64xf32>
    %14 = vector.broadcast %cst_4 : f32 to vector<128x64xf32>
    %15 = arith.select %12, %13, %14 : vector<128x64xi1>, vector<128x64xf32>
    %16 = arith.addf %9, %15 : vector<128x64xf32>
    %17 = vector.extract_strided_slice %0 {offsets = [0, 2], sizes = [128, 1], strides = [1, 1]} : vector<128x8xi32> to vector<128x1xi32>
    %18 = vector.broadcast %17 : vector<128x1xi32> to vector<128x64xi32>
    %19 = arith.cmpi eq, %18, %1 : vector<128x64xi32>
    %cst_5 = arith.constant 1.000000e+00 : f32
    %cst_6 = arith.constant 0.000000e+00 : f32
    %20 = vector.broadcast %cst_5 : f32 to vector<128x64xf32>
    %21 = vector.broadcast %cst_6 : f32 to vector<128x64xf32>
    %22 = arith.select %19, %20, %21 : vector<128x64xi1>, vector<128x64xf32>
    %23 = arith.addf %16, %22 : vector<128x64xf32>
    %24 = vector.extract_strided_slice %0 {offsets = [0, 3], sizes = [128, 1], strides = [1, 1]} : vector<128x8xi32> to vector<128x1xi32>
    %25 = vector.broadcast %24 : vector<128x1xi32> to vector<128x64xi32>
    %26 = arith.cmpi eq, %25, %1 : vector<128x64xi32>
    %cst_7 = arith.constant 1.000000e+00 : f32
    %cst_8 = arith.constant 0.000000e+00 : f32
    %27 = vector.broadcast %cst_7 : f32 to vector<128x64xf32>
    %28 = vector.broadcast %cst_8 : f32 to vector<128x64xf32>
    %29 = arith.select %26, %27, %28 : vector<128x64xi1>, vector<128x64xf32>
    %30 = arith.addf %23, %29 : vector<128x64xf32>
    %31 = vector.extract_strided_slice %0 {offsets = [0, 4], sizes = [128, 1], strides = [1, 1]} : vector<128x8xi32> to vector<128x1xi32>
    %32 = vector.broadcast %31 : vector<128x1xi32> to vector<128x64xi32>
    %33 = arith.cmpi eq, %32, %1 : vector<128x64xi32>
    %cst_9 = arith.constant 1.000000e+00 : f32
    %cst_10 = arith.constant 0.000000e+00 : f32
    %34 = vector.broadcast %cst_9 : f32 to vector<128x64xf32>
    %35 = vector.broadcast %cst_10 : f32 to vector<128x64xf32>
    %36 = arith.select %33, %34, %35 : vector<128x64xi1>, vector<128x64xf32>
    %37 = arith.addf %30, %36 : vector<128x64xf32>
    %38 = vector.extract_strided_slice %0 {offsets = [0, 5], sizes = [128, 1], strides = [1, 1]} : vector<128x8xi32> to vector<128x1xi32>
    %39 = vector.broadcast %38 : vector<128x1xi32> to vector<128x64xi32>
    %40 = arith.cmpi eq, %39, %1 : vector<128x64xi32>
    %cst_11 = arith.constant 1.000000e+00 : f32
    %cst_12 = arith.constant 0.000000e+00 : f32
    %41 = vector.broadcast %cst_11 : f32 to vector<128x64xf32>
    %42 = vector.broadcast %cst_12 : f32 to vector<128x64xf32>
    %43 = arith.select %40, %41, %42 : vector<128x64xi1>, vector<128x64xf32>
    %44 = arith.addf %37, %43 : vector<128x64xf32>
    %45 = vector.extract_strided_slice %0 {offsets = [0, 6], sizes = [128, 1], strides = [1, 1]} : vector<128x8xi32> to vector<128x1xi32>
    %46 = vector.broadcast %45 : vector<128x1xi32> to vector<128x64xi32>
    %47 = arith.cmpi eq, %46, %1 : vector<128x64xi32>
    %cst_13 = arith.constant 1.000000e+00 : f32
    %cst_14 = arith.constant 0.000000e+00 : f32
    %48 = vector.broadcast %cst_13 : f32 to vector<128x64xf32>
    %49 = vector.broadcast %cst_14 : f32 to vector<128x64xf32>
    %50 = arith.select %47, %48, %49 : vector<128x64xi1>, vector<128x64xf32>
    %51 = arith.addf %44, %50 : vector<128x64xf32>
    %52 = vector.extract_strided_slice %0 {offsets = [0, 7], sizes = [128, 1], strides = [1, 1]} : vector<128x8xi32> to vector<128x1xi32>
    %53 = vector.broadcast %52 : vector<128x1xi32> to vector<128x64xi32>
    %54 = arith.cmpi eq, %53, %1 : vector<128x64xi32>
    %cst_15 = arith.constant 1.000000e+00 : f32
    %cst_16 = arith.constant 0.000000e+00 : f32
    %55 = vector.broadcast %cst_15 : f32 to vector<128x64xf32>
    %56 = vector.broadcast %cst_16 : f32 to vector<128x64xf32>
    %57 = arith.select %54, %55, %56 : vector<128x64xi1>, vector<128x64xf32>
    %58 = arith.addf %51, %57 : vector<128x64xf32>
    %cst_17 = arith.constant 1.250000e-01 : f32
    %59 = vector.broadcast %cst_17 : f32 to vector<128x64xf32>
    %60 = arith.mulf %58, %59 : vector<128x64xf32>
    %c0_18 = arith.constant 0 : index
    %c0_19 = arith.constant 0 : index
    %61 = vector.load %arg2[%c0_18, %c0_19] : memref<64x64xf32, #tpu.memory_space<vmem>>, vector<64x64xf32>
    %cst_20 = arith.constant dense<0.000000e+00> : vector<128x64xf32>
    %62 = tpu.matmul %60, %61, %cst_20 {dimension_numbers = #tpu.dot_dimension_numbers<[1], [0], [0], [1], [0, 0, 1, 1], [], []>} : vector<128x64xf32>, vector<64x64xf32>, vector<128x64xf32> -> vector<128x64xf32>
    %c0_21 = arith.constant 0 : index
    %c0_22 = arith.constant 0 : index
    %63 = vector.load %arg3[%c0_21, %c0_22] : memref<1x64xf32, #tpu.memory_space<vmem>>, vector<1x64xf32>
    %64 = vector.broadcast %63 : vector<1x64xf32> to vector<128x64xf32>
    %65 = arith.addf %62, %64 : vector<128x64xf32>
    %cst_23 = arith.constant 0.000000e+00 : f32
    %66 = vector.broadcast %cst_23 : f32 to vector<128x64xf32>
    %67 = arith.maximumf %65, %66 : vector<128x64xf32>
    %c0_24 = arith.constant 0 : index
    %c0_25 = arith.constant 0 : index
    %68 = vector.load %arg4[%c0_24, %c0_25] : memref<64x32xf32, #tpu.memory_space<vmem>>, vector<64x32xf32>
    %cst_26 = arith.constant dense<0.000000e+00> : vector<128x32xf32>
    %69 = tpu.matmul %67, %68, %cst_26 {dimension_numbers = #tpu.dot_dimension_numbers<[1], [0], [0], [1], [0, 0, 1, 1], [], []>} : vector<128x64xf32>, vector<64x32xf32>, vector<128x32xf32> -> vector<128x32xf32>
    %c0_27 = arith.constant 0 : index
    %c0_28 = arith.constant 0 : index
    %70 = vector.load %arg5[%c0_27, %c0_28] : memref<1x32xf32, #tpu.memory_space<vmem>>, vector<1x32xf32>
    %71 = vector.broadcast %70 : vector<1x32xf32> to vector<128x32xf32>
    %72 = arith.addf %69, %71 : vector<128x32xf32>
    %cst_29 = arith.constant 0.000000e+00 : f32
    %73 = vector.broadcast %cst_29 : f32 to vector<128x32xf32>
    %74 = arith.maximumf %72, %73 : vector<128x32xf32>
    %c0_30 = arith.constant 0 : index
    %c0_31 = arith.constant 0 : index
    %75 = vector.load %arg6[%c0_30, %c0_31] : memref<32x128xf32, #tpu.memory_space<vmem>>, vector<32x128xf32>
    %cst_32 = arith.constant dense<0.000000e+00> : vector<128x128xf32>
    %76 = tpu.matmul %74, %75, %cst_32 {dimension_numbers = #tpu.dot_dimension_numbers<[1], [0], [0], [1], [0, 0, 1, 1], [], []>} : vector<128x32xf32>, vector<32x128xf32>, vector<128x128xf32> -> vector<128x128xf32>
    %c0_33 = arith.constant 0 : index
    %c0_34 = arith.constant 0 : index
    %77 = vector.load %arg7[%c0_33, %c0_34] : memref<1x128xf32, #tpu.memory_space<vmem>>, vector<1x128xf32>
    %78 = vector.broadcast %77 : vector<1x128xf32> to vector<128x128xf32>
    %79 = arith.addf %76, %78 : vector<128x128xf32>
    %c0_35 = arith.constant 0 : index
    %c0_36 = arith.constant 0 : index
    %80 = vector.load %arg8[%c0_35, %c0_36] : memref<128x128xf32, #tpu.memory_space<vmem>>, vector<128x128xf32>
    tpu.vector_store %arg8[%c0_35, %c0_36], %79 {strides = array<i32>} : memref<128x128xf32, #tpu.memory_space<vmem>>, vector<128x128xf32>,
    return
  }
  func.func @transform_0(%arg0: i32) -> (i32, i32) {
    %c0_i32 = arith.constant 0 : i32
    %c0_i32_0 = arith.constant 0 : i32
    return %arg0, %c0_i32 : i32, i32
  }
  func.func @transform_1(%arg0: i32) -> (i32, i32) {
    %c0_i32 = arith.constant 0 : i32
    %c0_i32_0 = arith.constant 0 : i32
    %c0_i32_1 = arith.constant 0 : i32
    return %c0_i32, %c0_i32_0 : i32, i32
  }
  func.func @transform_2(%arg0: i32) -> (i32, i32) {
    %c0_i32 = arith.constant 0 : i32
    %c0_i32_0 = arith.constant 0 : i32
    %c0_i32_1 = arith.constant 0 : i32
    return %c0_i32, %c0_i32_0 : i32, i32
  }
  func.func @transform_3(%arg0: i32) -> (i32, i32) {
    %c0_i32 = arith.constant 0 : i32
    %c0_i32_0 = arith.constant 0 : i32
    %c0_i32_1 = arith.constant 0 : i32
    return %c0_i32, %c0_i32_0 : i32, i32
  }
  func.func @transform_4(%arg0: i32) -> (i32, i32) {
    %c0_i32 = arith.constant 0 : i32
    %c0_i32_0 = arith.constant 0 : i32
    %c0_i32_1 = arith.constant 0 : i32
    return %c0_i32, %c0_i32_0 : i32, i32
  }
  func.func @transform_5(%arg0: i32) -> (i32, i32) {
    %c0_i32 = arith.constant 0 : i32
    %c0_i32_0 = arith.constant 0 : i32
    %c0_i32_1 = arith.constant 0 : i32
    return %c0_i32, %c0_i32_0 : i32, i32
  }
  func.func @transform_6(%arg0: i32) -> (i32, i32) {
    %c0_i32 = arith.constant 0 : i32
    %c0_i32_0 = arith.constant 0 : i32
    %c0_i32_1 = arith.constant 0 : i32
    return %c0_i32, %c0_i32_0 : i32, i32
  }
  func.func @transform_7(%arg0: i32) -> (i32, i32) {
    %c0_i32 = arith.constant 0 : i32
    %c0_i32_0 = arith.constant 0 : i32
    return %arg0, %c0_i32 : i32, i32
  }
}

</mosaic_0001>

<bundles_post_ra>
// kernel: tpu_custom_call.1
= control target key start
LH: loop header
LB: loop body
LE: loop exit
PB: predicated region body
PF: predicated region fallthrough
CT: control target
= control target key end

     0   :  { %12 = vsyncpa [#allocation3], 0  ;;  %s3414_s0 = inlined_call_operand.vmem [shape: s32[256,8], index: 0, kind: input, shape index: {}]   ;;  %s3415_s1 = inlined_call_operand.vmem [shape: f32[64,64], index: 1, kind: input, shape index: {}]   ;;  %s3416_s2 = inlined_call_operand.vmem [shape: f32[1,64], index: 2, kind: input, shape index: {}]   ;;  %s3417_s3 = inlined_call_operand.vmem [shape: f32[64,32], index: 3, kind: input, shape index: {}]   ;;  %s3418_s4 = inlined_call_operand.vmem [shape: f32[1,32], index: 4, kind: input, shape index: {}]   ;;  %s3419_s5 = inlined_call_operand.vmem [shape: f32[32,128], index: 5, kind: input, shape index: {}]   ;;  %s3420_s6 = inlined_call_operand.vmem [shape: f32[1,128], index: 6, kind: input, shape index: {}]   ;;  %s3421_s7 = inlined_call_operand.hbm [shape: f32[256,128], index: 7, kind: output, shape index: {}]  }
   0x1   :  { %14 = vsyncpa [#allocation3 + $0x1], 0  ;;  %s2377_s24 = smov 0   ;;  %s2379_s25 = smov 0  }
   0x2   :  { %s2381_s26 = smov 0   ;;  %s2383_s27 = smov 0  }
   0x3 LB: > { %s2398_s28 = sadd.s32 4294967295, %s2323_s27   ;;  %s1828_s29 = sadd.s32 4294967294, %s2323_s27   ;;  %s2323_s27 = sphi %s2383_s27, %s3456_s27   ;;  %s2319_s26 = sphi %s2381_s26, %s3455_s26   ;;  %s2315_s25 = sphi %s2379_s25, %s3454_s25   ;;  %s2311_s24 = sphi %s2377_s24, %s3453_s24  }
   0x4   : > { %s2402_s30 = sadd.s32 1, %s2323_s27   ;;  %s179_s8 = sadd.s32 1, %s2319_s26 }
   0x5   : > { %s176_s9 = ssub.s32 %s2323_s27, %s2402_s30  ;;  %p189_p0 = scmp.ne.s32.totalorder %s2319_s26, %s2315_s25 }
   0x6   : > { %p177_p1 = scmp.eq.s32.totalorder %s176_s9, 0  ;;  %p190_p2 = scmp.eq.s32.totalorder %s2398_s28, 1 }
   0x7   : > { %p195_p3 = scmp.ne.s32.totalorder %s2315_s25, %s2311_s24  ;;  %p196_p4 = scmp.eq.s32.totalorder %s1828_s29, 1 }
   0x8   : > { %s2413_s10 = scalar_select %p177_p1, %s2319_s26, %s179_s8  }
   0x9   : > { %p2415_p5 = por %p190_p2, %p189_p0  ;;  %p2419_p6 = por %p196_p4, %p195_p3 }
   0xa   : > { %p1831_p7 = scmp.ge.s32.totalorder %s2323_s27, 1  ;;  %p241_p8 = scmp.lt.s32.totalorder %s2323_s27, 3 }
   0xc   : > { %p242_p9 = pnand %p1831_p7, %p241_p8 }
   0xe   : > { %245 = sbr.rel (%p242_p9) target bundleno = 1230 (0x4ce), region = 48 }
  0x15   : > { %s1833_s13 = sshll.u32 %s2398_s28, 4  ;;  %v3422_v0 = vmov 4   ;;  %v3428_v1 = vmov 0   ;;  %v3432_v5 = vmov 1   ;;  %v3426_v7 = vmov 2   ;;  %v1082_v32 = vld [vmem:[%s3415_s1] sm:$0xff] }
  0x16   : > { %2178 = vset.pattern.permute.xlu0 %v3422_v0  ;;  %2170 = vset.pattern.permute.xlu1 %v3428_v1  ;;  %p274_p10 = scmp.lt.s32.totalorder %s1833_s13, 31  ;;  %v3433_v16 = vmov 3   ;;  %v3424_v19 = vmov 5   ;;  %v3430_v20 = vmov 6   ;;  %v3435_v22 = vmov 7   ;;  %v1083_v33 = vld [vmem:[%s3415_s1 + $0x8] sm:$0xff] }
  0x17   : > { %v2072_v35 = vpack.c.bf16 %v1083_v33, %v1082_v32  ;;  %v1084_v37 = vld [vmem:[%s3415_s1 + $0x10] sm:$0xff]  ;;  %v1085_v38 = vld [vmem:[%s3415_s1 + $0x18] sm:$0xff]  ;;  %v1086_v42 = vld [vmem:[%s3415_s1 + $0x20] sm:$0xff]  ;;  %v296_v50 = vlaneseq  ;;  %v2333_v56 = vmov 0.0   ;;  %s1891_s8 = sshll.u32 %s2398_s28, 11  ;;  %s2334_s18 = smov [#allocation2]  }
  0x18   : > { %s3458_s13 = smov (!%p274_p10, %s1833_s13), 31  ;;  %v2076_v39 = vpack.c.bf16 %v1085_v38, %v1084_v37  ;;  %v1087_v43 = vld [vmem:[%s3415_s1 + $0x28] sm:$0xff]  ;;  %v1088_v47 = vld [vmem:[%s3415_s1 + $0x30] sm:$0xff]  ;;  %v1089_v48 = vld [vmem:[%s3415_s1 + $0x38] sm:$0xff]  ;;  %s3365_s15 = scalar_lea.hbm %s3421_s7, %s1891_s8 }
  0x19   : > { %s1834_s14 = sshll.u32 %s3458_s13, 3  ;;  %2073 = vmatprep.subr.bf16.mxu0 %v2072_v35  ;;  %2112 = vmatprep.subr.bf16.mxu1 %v2072_v35  ;;  %v2080_v44 = vpack.c.bf16 %v1087_v43, %v1086_v42  ;;  %v2084_v49 = vpack.c.bf16 %v1089_v48, %v1088_v47  ;;  %v2646_v53 = vand.u32 127, %v296_v50  ;;  %s2265_s19 = sshll.u32 %s2334_s18, 4  ;;  %s2266_s19 = int_to_ptr.vmem [resolvable:$false] %s2265_s19 }
  0x1a   : > { %s2431_s17 = scalar_lea.vmem %s3414_s0, %s1834_s14  ;;  %2075 = vmatpush3.bf16.msra.mxu0 %v2072_v35  ;;  %2116 = vmatpush3.bf16.msra.mxu1 %v2072_v35  ;;  %s2267_s20 = scalar_lea.vmem %s2266_s19, 4096 }
  0x1b   : > { %v2434_v2 = vld [vmem:[%s2431_s17 + $0x8] sm:$0xff]  ;;  %v2437_v3 = vld [vmem:[%s2431_s17] sm:$0xff]  ;;  %v2442_v4 = vld [vmem:[%s2431_s17 + $0x10] sm:$0xff]  ;;  %2077 = vmatprep.subr.bf16.mxu0 %v2076_v39  ;;  %2113 = vmatprep.subr.bf16.mxu1 %v2076_v39 }
  0x1c   : > { %302 = vperm.xlu1 %2170, %v2434_v2   ;;  %683 = vperm.xlu0 %2178, %v2437_v3   ;;  %v2448_v6 = vld [vmem:[%s2431_s17 + $0x18] sm:$0xff]  ;;  %v2453_v8 = vld [vmem:[%s2431_s17 + $0x40] sm:$0xff]  ;;  %v2458_v9 = vld [vmem:[%s2431_s17 + $0x48] sm:$0xff] }
  0x1d   : > { %v2468_v10 = vld [vmem:[%s2431_s17 + $0x20] sm:$0xff]  ;;  %v2474_v11 = vld [vmem:[%s2431_s17 + $0x30] sm:$0xff]  ;;  %v2480_v12 = vld [vmem:[%s2431_s17 + $0x58] sm:$0xff] }
  0x1e   : > { %v2485_v13 = vld [vmem:[%s2431_s17 + $0x60] sm:$0xff]  ;;  %v2494_v14 = vld [vmem:[%s2431_s17 + $0x38] sm:$0xff]  ;;  %v2502_v15 = vld [vmem:[%s2431_s17 + $0x68] sm:$0xff]  ;;  %2079 = vmatpush3.bf16.msra.mxu0 %v2076_v39  ;;  %2117 = vmatpush3.bf16.msra.mxu1 %v2076_v39 }
  0x1f   : > { %v2508_v17 = vld [vmem:[%s2431_s17 + $0x70] sm:$0xff]  ;;  %v2511_v18 = vld [vmem:[%s2431_s17 + $0x28] sm:$0xff]  ;;  %v2545_v21 = vld [vmem:[%s2431_s17 + $0x78] sm:$0xff]  ;;  %2081 = vmatprep.subr.bf16.mxu0 %v2080_v44  ;;  %2114 = vmatprep.subr.bf16.mxu1 %v2080_v44 }
  0x20   : > { %2171 = vset.pattern.permute.xlu1 %v3432_v5  ;;  %689 = vperm.xlu0 %2178, %v2442_v4   ;;  %v2666_v63 = vld [vmem:[%s2431_s17 + $0x50] sm:$0xff] }
  0x21   : > { %398 = vperm.xlu1 %2171, %v2434_v2  }
  0x22   : > { %2083 = vmatpush3.bf16.msra.mxu0 %v2080_v44  ;;  %2118 = vmatpush3.bf16.msra.mxu1 %v2080_v44 }
  0x23   : > { %2085 = vmatprep.subr.bf16.mxu0 %v2084_v49  ;;  %2115 = vmatprep.subr.bf16.mxu1 %v2084_v49 }
  0x24   : > { %692 = vperm.xlu0 %2178, %v2448_v6  }
  0x25   : > { %2172 = vset.pattern.permute.xlu1 %v3426_v7 }
  0x26   : > { %491 = vperm.xlu1 %2172, %v2437_v3   ;;  %2087 = vmatpush3.bf16.msra.mxu0 %v2084_v49 }
  0x27   : > { %2119 = vmatpush3.bf16.msra.mxu1 %v2084_v49 }
  0x28   : > { %707 = vperm.xlu0 %2178, %v2453_v8  }
  0x2a   : > { %2173 = vset.pattern.permute.xlu1 %v3428_v1 }
  0x2b   : > { %305 = vperm.xlu1 %2173, %v2442_v4  }
  0x2c   : > { %710 = vperm.xlu0 %2178, %v2458_v9  }
  0x2f   : > { %2174 = vset.pattern.permute.xlu1 %v3432_v5 }
  0x30   : > { %2219 = vset.pattern.permute.xlu0 %v3428_v1  ;;  %401 = vperm.xlu1 %2174, %v2442_v4  }
  0x31   : > { %299 = vperm.xlu0 %2219, %v2437_v3  }
  0x34   : > { %2175 = vset.pattern.permute.xlu1 %v3428_v1 }
  0x35   : > { %311 = vperm.xlu0 %2219, %v2468_v10   ;;  %308 = vperm.xlu1 %2175, %v2448_v6  }
  0x39   : > { %317 = vperm.xlu0 %2219, %v2474_v11   ;;  %2176 = vset.pattern.permute.xlu1 %v3432_v5 }
  0x3a   : > { %404 = vperm.xlu1 %2176, %v2448_v6  }
  0x3d   : > { %332 = vperm.xlu0 %2219, %v2480_v12  }
  0x3e   : > { %2177 = vset.pattern.permute.xlu1 %v3426_v7 }
  0x3f   : > { %497 = vperm.xlu1 %2177, %v2442_v4  }
  0x41   : > { %335 = vperm.xlu0 %2219, %v2485_v13  }
  0x43   : > { %500 = vperm.xlu1 %2177, %v2448_v6  }
  0x45   : > { %2221 = vset.pattern.permute.xlu0 %v3432_v5 }
  0x46   : > { %395 = vperm.xlu0 %2221, %v2437_v3  }
  0x47   : > { %2179 = vset.pattern.permute.xlu1 %v3422_v0 }
  0x48   : > { %686 = vperm.xlu1 %2179, %v2434_v2  }
  0x4a   : > { %416 = vperm.xlu0 %2221, %v2494_v14  }
  0x4c   : > { %2180 = vset.pattern.permute.xlu1 %v3432_v5 }
  0x4d   : > { %407 = vperm.xlu1 %2180, %v2468_v10  }
  0x4e   : > { %419 = vperm.xlu0 %2221, %v2453_v8  }
  0x51   : > { %2181 = vset.pattern.permute.xlu1 %v3433_v16 }
  0x52   : > { %434 = vperm.xlu0 %2221, %v2502_v15   ;;  %593 = vperm.xlu1 %2181, %v2442_v4  }
  0x56   : > { %437 = vperm.xlu0 %2221, %v2508_v17   ;;  %2182 = vset.pattern.permute.xlu1 %v3428_v1 }
  0x57   : > { %314 = vperm.xlu1 %2182, %v2511_v18  }
  0x5a   : > { %2233 = vset.pattern.permute.xlu0 %v3433_v16 }
  0x5b   : > { %587 = vperm.xlu0 %2233, %v2437_v3   ;;  %2183 = vset.pattern.permute.xlu1 %v3432_v5 }
  0x5c   : > { %410 = vperm.xlu1 %2183, %v2511_v18  }
  0x5f   : > { %590 = vperm.xlu0 %2233, %v2434_v2  }
  0x60   : > { %2184 = vset.pattern.permute.xlu1 %v3424_v19 }
  0x61   : > { %782 = vperm.xlu1 %2184, %v2434_v2  }
  0x63   : > { %596 = vperm.xlu0 %2233, %v2448_v6  }
  0x65   : > { %2185 = vset.pattern.permute.xlu1 %v3426_v7 }
  0x66   : > { %503 = vperm.xlu1 %2185, %v2468_v10  }
  0x67   : > { %608 = vperm.xlu0 %2233, %v2494_v14  }
  0x6a   : > { %2186 = vset.pattern.permute.xlu1 %v3430_v20 }
  0x6b   : > { %611 = vperm.xlu0 %2233, %v2453_v8   ;;  %875 = vperm.xlu1 %2186, %v2437_v3  }
  0x6f   : > { %626 = vperm.xlu0 %2233, %v2502_v15   ;;  %2187 = vset.pattern.permute.xlu1 %v3426_v7 }
  0x70   : > { %506 = vperm.xlu1 %2187, %v2511_v18  }
  0x73   : > { %2238 = vset.pattern.permute.xlu0 %v3426_v7 }
  0x74   : > { %494 = vperm.xlu0 %2238, %v2434_v2   ;;  %2188 = vset.pattern.permute.xlu1 %v3430_v20 }
  0x75   : > { %878 = vperm.xlu1 %2188, %v2434_v2  }
  0x78   : > { %515 = vperm.xlu0 %2238, %v2453_v8  }
  0x79   : > { %2189 = vset.pattern.permute.xlu1 %v3432_v5 }
  0x7a   : > { %413 = vperm.xlu1 %2189, %v2474_v11  }
  0x7c   : > { %518 = vperm.xlu0 %2238, %v2458_v9  }
  0x7e   : > { %2190 = vset.pattern.permute.xlu1 %v3433_v16 }
  0x7f   : > { %599 = vperm.xlu1 %2190, %v2468_v10  }
  0x80   : > { %533 = vperm.xlu0 %2238, %v2508_v17  }
  0x83   : > { %2191 = vset.pattern.permute.xlu1 %v3435_v22 }
  0x84   : > { %536 = vperm.xlu0 %2238, %v2545_v21   ;;  %971 = vperm.xlu1 %2191, %v2437_v3  }
  0x88   : > { %2243 = vset.pattern.permute.xlu0 %v3430_v20  ;;  %2192 = vset.pattern.permute.xlu1 %v3428_v1 }
  0x89   : > { %881 = vperm.xlu0 %2243, %v2442_v4   ;;  %320 = vperm.xlu1 %2192, %v2494_v14  }
  0x8d   : > { %884 = vperm.xlu0 %2243, %v2448_v6   ;;  %2193 = vset.pattern.permute.xlu1 %v3433_v16 }
  0x8e   : > { %602 = vperm.xlu1 %2193, %v2511_v18  }
  0x91   : > { %890 = vperm.xlu0 %2243, %v2511_v18  }
  0x92   : > { %2194 = vset.pattern.permute.xlu1 %v3424_v19 }
  0x93   : > { %788 = vperm.xlu1 %2194, %v2448_v6  }
  0x95   : > { %899 = vperm.xlu0 %2243, %v2453_v8  }
  0x97   : > { %2195 = vset.pattern.permute.xlu1 %v3426_v7 }
  0x98   : > { %509 = vperm.xlu1 %2195, %v2474_v11  }
  0x99   : > { %902 = vperm.xlu0 %2243, %v2458_v9  }
  0x9b   : > { %v2564_v23 = vpop.permute.xlu1 %302  ;;  %v2566_v24 = vpop.permute.xlu0 %683 }
  0x9c   : > { %2196 = vset.pattern.permute.xlu1 %v3422_v0  ;;  %vm730_vm3 = vcmp.eq.s32.totalorder %v2566_v24, %v2646_v53  ;;  %vm347_vm15 = vcmp.eq.s32.totalorder %v2564_v23, %v2646_v53 }
  0x9d   : > { %908 = vperm.xlu0 %2243, %v2480_v12   ;;  %695 = vperm.xlu1 %2196, %v2468_v10   ;;  %v363_v23 = vsel %vm347_vm15, 1.0, %v2333_v56 }
  0x9f   : > { %v2571_v25 = vpop.permute.xlu0 %689 }
  0xa0   : > { %v2573_v26 = vpop.permute.xlu1 %398 }
  0xa1   : > { %911 = vperm.xlu0 %2243, %v2485_v13   ;;  %2197 = vset.pattern.permute.xlu1 %v3426_v7  ;;  %vm443_vm14 = vcmp.eq.s32.totalorder %v2573_v26, %v2646_v53 }
  0xa2   : > { %512 = vperm.xlu1 %2197, %v2494_v14  }
  0xa3   : > { %v2578_v27 = vpop.permute.xlu0 %692 }
  0xa4   : > { %vm733_vm8 = vcmp.eq.s32.totalorder %v2578_v27, %v2646_v53 }
  0xa5   : > { %2250 = vset.pattern.permute.xlu0 %v3424_v19  ;;  %v2581_v28 = vpop.permute.xlu1 %491  ;;  %v749_v50 = vsel %vm733_vm8, 1.0, %v2333_v56 }
  0xa6   : > { %779 = vperm.xlu0 %2250, %v2437_v3   ;;  %2198 = vset.pattern.permute.xlu1 %v3422_v0  ;;  %vm538_vm2 = vcmp.eq.s32.totalorder %v2581_v28, %v2646_v53  ;;  %v746_v28 = vsel %vm730_vm3, 1.0, %v2333_v56 }
  0xa7   : > { %698 = vperm.xlu1 %2198, %v2511_v18   ;;  %v2586_v29 = vpop.permute.xlu0 %707  ;;  %v554_v33 = vsel %vm538_vm2, 1.0, %v2333_v56 }
  0xaa   : > { %785 = vperm.xlu0 %2250, %v2442_v4   ;;  %v2589_v30 = vpop.permute.xlu1 %305 }
  0xab   : > { %2199 = vset.pattern.permute.xlu1 %v3428_v1  ;;  %v2592_v31 = vpop.permute.xlu0 %710 }
  0xac   : > { %323 = vperm.xlu1 %2199, %v2453_v8  }
  0xae   : > { %800 = vperm.xlu0 %2250, %v2494_v14  }
  0xaf   : > { %v2602_v34 = vpop.permute.xlu1 %401 }
  0xb0   : > { %2200 = vset.pattern.permute.xlu1 %v3433_v16  ;;  %v300_v36 = vpop.permute.xlu0 %299  ;;  %vm444_vm8 = vcmp.eq.s32.totalorder %v2602_v34, %v2646_v53 }
  0xb1   : > { %605 = vperm.xlu1 %2200, %v2474_v11   ;;  %vm346_vm0 = vcmp.eq.s32.totalorder %v300_v36, %v2646_v53 }
  0xb2   : > { %803 = vperm.xlu0 %2250, %v2453_v8   ;;  %v362_v57 = vsel %vm346_vm0, 1.0, %v2333_v56 }
  0xb4   : > { %v2613_v40 = vpop.permute.xlu1 %308  ;;  %v2615_v41 = vpop.permute.xlu0 %311 }
  0xb5   : > { %2201 = vset.pattern.permute.xlu1 %v3424_v19  ;;  %vm349_vm6 = vcmp.eq.s32.totalorder %v2613_v40, %v2646_v53 }
  0xb6   : > { %821 = vperm.xlu0 %2250, %v2508_v17   ;;  %791 = vperm.xlu1 %2201, %v2468_v10   ;;  %v365_v44 = vsel %vm349_vm6, 1.0, %v2333_v56  ;;  %vm348_vm6 = vcmp.eq.s32.totalorder %v2589_v30, %v2646_v53 }
  0xb7   : > { %v364_v34 = vsel %vm348_vm6, 1.0, %v2333_v56 }
  0xb8   : > { %v2626_v45 = vpop.permute.xlu0 %317 }
  0xb9   : > { %v2628_v46 = vpop.permute.xlu1 %404 }
  0xba   : > { %2252 = vset.pattern.permute.xlu0 %v3435_v22  ;;  %2202 = vset.pattern.permute.xlu1 %v3428_v1  ;;  %vm445_vm4 = vcmp.eq.s32.totalorder %v2628_v46, %v2646_v53 }
  0xbb   : > { %974 = vperm.xlu0 %2252, %v2434_v2   ;;  %326 = vperm.xlu1 %2202, %v2458_v9   ;;  %v461_v39 = vsel %vm445_vm4, 1.0, %v2333_v56 }
  0xbc   : > { %v2640_v51 = vpop.permute.xlu0 %332  ;;  %v477_v40 = vadd.f32 %v461_v39, %v365_v44 }
  0xbe   : > { %v2642_v52 = vpop.permute.xlu1 %497 }
  0xbf   : > { %977 = vperm.xlu0 %2252, %v2442_v4   ;;  %2203 = vset.pattern.permute.xlu1 %v3432_v5 }
  0xc0   : > { %422 = vperm.xlu1 %2203, %v2458_v9   ;;  %v2649_v54 = vpop.permute.xlu0 %335 }
  0xc2   : > { %v501_v55 = vpop.permute.xlu1 %500 }
  0xc3   : > { %992 = vperm.xlu0 %2252, %v2494_v14   ;;  %vm541_vm7 = vcmp.eq.s32.totalorder %v501_v55, %v2646_v53 }
  0xc4   : > { %2204 = vset.pattern.permute.xlu1 %v3424_v19  ;;  %v557_v46 = vsel %vm541_vm7, 1.0, %v2333_v56 }
  0xc5   : > { %v396_v58 = vpop.permute.xlu0 %395  ;;  %794 = vperm.xlu1 %2204, %v2511_v18   ;;  %v573_v49 = vadd.f32 %v557_v46, %v477_v40 }
  0xc6   : > { %vm442_vm1 = vcmp.eq.s32.totalorder %v396_v58, %v2646_v53 }
  0xc7   : > { %v458_v59 = vsel %vm442_vm1, 1.0, %v2333_v56  ;;  %995 = vperm.xlu0 %2252, %v2453_v8   ;;  %v2659_v60 = vpop.permute.xlu1 %686 }
  0xc8   : > { %v474_v61 = vadd.f32 %v458_v59, %v362_v57 }
  0xc9   : > { %2205 = vset.pattern.permute.xlu1 %v3435_v22  ;;  %v2662_v62 = vpop.permute.xlu0 %416 }
  0xca   : > { %980 = vperm.xlu1 %2205, %v2448_v6   ;;  %v570_v36 = vadd.f32 %v554_v33, %v474_v61  ;;  %vm449_vm10 = vcmp.eq.s32.totalorder %v2662_v62, %v2646_v53 }
  0xcb   : > { %1001 = vperm.xlu0 %2252, %v2666_v63  }
  0xcc   : > { %v2669_v2 = vpop.permute.xlu1 %407 }
  0xcd   : > { %v2671_v3 = vpop.permute.xlu0 %419 }
  0xce   : > { %2206 = vset.pattern.permute.xlu1 %v3422_v0  ;;  %vm450_vm3 = vcmp.eq.s32.totalorder %v2671_v3, %v2646_v53 }
  0xcf   : > { %701 = vperm.xlu1 %2206, %v2474_v11   ;;  %1004 = vperm.xlu0 %2252, %v2480_v12  }
  0xd1   : > { %v2676_v4 = vpop.permute.xlu1 %593  ;;  %v2678_v8 = vpop.permute.xlu0 %434 }
  0xd2   : > { %vm636_vm15 = vcmp.eq.s32.totalorder %v2676_v4, %v2646_v53 }
  0xd3   : > { %2207 = vset.pattern.permute.xlu1 %v3430_v20  ;;  %1010 = vperm.xlu0 %2252, %v2502_v15  }
  0xd4   : > { %887 = vperm.xlu1 %2207, %v2468_v10  }
  0xd5   : > { %v2683_v6 = vpop.permute.xlu0 %437 }
  0xd6   : > { %v2685_v32 = vpop.permute.xlu1 %314 }
  0xd7   : > { %1013 = vperm.xlu0 %2252, %v2508_v17  }
  0xd8   : > { %2208 = vset.pattern.permute.xlu1 %v3422_v0 }
  0xd9   : > { %704 = vperm.xlu1 %2208, %v2494_v14  }
  0xda   : > { %v588_v35 = vpop.permute.xlu0 %587 }
  0xdb   : > { %vm634_vm5 = vcmp.eq.s32.totalorder %v588_v35, %v2646_v53  ;;  %v2698_v37 = vpop.permute.xlu1 %410 }
  0xdc   : > { %v650_v38 = vsel %vm634_vm5, 1.0, %v2333_v56 }
  0xdd   : > { %v666_v24 = vadd.f32 %v650_v38, %v570_v36  ;;  %2209 = vset.pattern.permute.xlu1 %v3428_v1 }
  0xde   : > { %v2707_v42 = vpop.permute.xlu0 %590  ;;  %329 = vperm.xlu1 %2209, %v2666_v63  }
  0xdf   : > { %v2710_v43 = vadd.f32 %v746_v28, %v666_v24  ;;  %vm635_vm5 = vcmp.eq.s32.totalorder %v2707_v42, %v2646_v53 }
  0xe0   : > { %v2714_v47 = vpop.permute.xlu1 %782 }
  0xe2   : > { %v597_v48 = vpop.permute.xlu0 %596  ;;  %2210 = vset.pattern.permute.xlu1 %v3432_v5 }
  0xe3   : > { %vm637_vm9 = vcmp.eq.s32.totalorder %v597_v48, %v2646_v53  ;;  %425 = vperm.xlu1 %2210, %v2666_v63  }
  0xe4   : > { %v653_v55 = vsel %vm637_vm9, 1.0, %v2333_v56 }
  0xe5   : > { %v669_v57 = vadd.f32 %v653_v55, %v573_v49  ;;  %v2723_v58 = vpop.permute.xlu1 %503 }
  0xe6   : > { %v609_v59 = vpop.permute.xlu0 %608 }
  0xe7   : > { %v2725_v61 = vadd.f32 %v749_v50, %v669_v57  ;;  %2211 = vset.pattern.permute.xlu1 %v3424_v19  ;;  %vm641_vm12 = vcmp.eq.s32.totalorder %v609_v59, %v2646_v53  ;;  %v459_v59 = vsel %vm443_vm14, 1.0, %v2333_v56  ;;  %vm731_vm14 = vcmp.eq.s32.totalorder %v2659_v60, %v2646_v53 }
  0xe8   : > { %797 = vperm.xlu1 %2211, %v2474_v11  }
  0xea   : > { %v2729_v27 = vpop.permute.xlu1 %875  ;;  %v2731_v33 = vpop.permute.xlu0 %611 }
  0xeb   : > { %vm922_vm1 = vcmp.eq.s32.totalorder %v2729_v27, %v2646_v53  ;;  %vm642_vm9 = vcmp.eq.s32.totalorder %v2731_v33, %v2646_v53 }
  0xec   : > { %2212 = vset.pattern.permute.xlu1 %v3435_v22 }
  0xed   : > { %983 = vperm.xlu1 %2212, %v2468_v10  }
  0xee   : > { %v2735_v35 = vpop.permute.xlu0 %626 }
  0xef   : > { %v2737_v36 = vpop.permute.xlu1 %506 }
  0xf1   : > { %2213 = vset.pattern.permute.xlu1 %v3432_v5 }
  0xf2   : > { %428 = vperm.xlu1 %2213, %v2480_v12  }
  0xf3   : > { %v2741_v28 = vpop.permute.xlu0 %494 }
  0xf4   : > { %v2743_v38 = vpop.permute.xlu1 %878  ;;  %vm539_vm0 = vcmp.eq.s32.totalorder %v2741_v28, %v2646_v53 }
  0xf5   : > { %v555_v28 = vsel %vm539_vm0, 1.0, %v2333_v56  ;;  %vm732_vm0 = vcmp.eq.s32.totalorder %v2571_v25, %v2646_v53 }
  0xf6   : > { %2214 = vset.pattern.permute.xlu1 %v3433_v16 }
  0xf7   : > { %614 = vperm.xlu1 %2214, %v2458_v9   ;;  %v2747_v24 = vpop.permute.xlu0 %515 }
  0xf8   : > { %vm546_vm7 = vcmp.eq.s32.totalorder %v2747_v24, %v2646_v53 }
  0xf9   : > { %v2749_v39 = vpop.permute.xlu1 %413  ;;  %v562_v24 = vsel %vm546_vm7, 1.0, %v2333_v56 }
  0xfb   : > { %2215 = vset.pattern.permute.xlu1 %v3435_v22  ;;  %v2752_v10 = vpop.permute.xlu0 %518 }
  0xfc   : > { %986 = vperm.xlu1 %2215, %v2511_v18   ;;  %vm547_vm6 = vcmp.eq.s32.totalorder %v2752_v10, %v2646_v53 }
  0xfe   : > { %v2755_v44 = vpop.permute.xlu1 %599 }
  0xff   : > { %v2757_v46 = vpop.permute.xlu0 %533 }
 0x100   : > { %3439 = vst [vmem:[#allocation5_spill] sm:$0xff] %v2757_v46  ;;  %2216 = vset.pattern.permute.xlu1 %v3426_v7 }
 0x101   : > { %521 = vperm.xlu1 %2216, %v2666_v63  }
 0x103   : > { %v2761_v40 = vpop.permute.xlu1 %971  ;;  %v2763_v48 = vpop.permute.xlu0 %536 }
 0x104   : > { %3440 = vst [vmem:[#allocation6_spill] sm:$0xff] %v2763_v48  ;;  %vm1018_vm4 = vcmp.eq.s32.totalorder %v2761_v40, %v2646_v53 }
 0x105   : > { %2217 = vset.pattern.permute.xlu1 %v3430_v20  ;;  %v1034_v42 = vsel %vm1018_vm4, 1.0, %v2333_v56 }
 0x106   : > { %893 = vperm.xlu1 %2217, %v2474_v11  }
 0x108   : > { %v321_v49 = vpop.permute.xlu1 %320  ;;  %v2767_v50 = vpop.permute.xlu0 %881 }
 0x109   : > { %vm353_vm11 = vcmp.eq.s32.totalorder %v321_v49, %v2646_v53  ;;  %v657_v49 = vsel %vm641_vm12, 1.0, %v2333_v56  ;;  %vm1097_vm12 = vcmask 523264   ;;  %vm924_vm4 = vcmp.eq.s32.totalorder %v2767_v50, %v2646_v53 }
 0x10a   : > { %2218 = vset.pattern.permute.xlu1 %v3426_v7  ;;  %v369_v48 = vsel %vm353_vm11, 1.0, %v2333_v56  ;;  %vm540_vm11 = vcmp.eq.s32.totalorder %v2642_v52, %v2646_v53 }
 0x10b   : > { %524 = vperm.xlu1 %2218, %v2480_v12  }
 0x10c   : > { %v2771_v18 = vpop.permute.xlu0 %884 }
 0x10d   : > { %v2773_v55 = vpop.permute.xlu1 %602 }
 0x10f   : > { %2220 = vset.pattern.permute.xlu1 %v3430_v20 }
 0x110   : > { %896 = vperm.xlu1 %2220, %v2494_v14   ;;  %v2777_v57 = vpop.permute.xlu0 %890 }
 0x112   : > { %v2779_v0 = vpop.permute.xlu1 %788 }
 0x114   : > { %2222 = vset.pattern.permute.xlu1 %v3432_v5  ;;  %v2782_v19 = vpop.permute.xlu0 %899  ;;  %v465_v5 = vsel %vm449_vm10, 1.0, %v2333_v56 }
 0x115   : > { %431 = vperm.xlu1 %2222, %v2485_v13   ;;  %v481_v62 = vadd.f32 %v465_v5, %v369_v48  ;;  %v3443_v48 = vmov 3  }
 0x117   : > { %v2785_v7 = vpop.permute.xlu1 %509 }
 0x118   : > { %v2787_v1 = vpop.permute.xlu0 %902 }
 0x119   : > { %2223 = vset.pattern.permute.xlu1 %v3433_v16 }
 0x11a   : > { %617 = vperm.xlu1 %2223, %v2666_v63  }
 0x11c   : > { %v2794_v14 = vpop.permute.xlu1 %695  ;;  %v2796_v20 = vpop.permute.xlu0 %908 }
 0x11d   : > { %3441 = vst [vmem:[#allocation7_spill] sm:$0xff] %v2796_v20  ;;  %v3442_v20 = vmov 0  }
 0x11e   : > { %2224 = vset.pattern.permute.xlu1 %v3435_v22 }
 0x11f   : > { %989 = vperm.xlu1 %2224, %v2474_v11  }
 0x120   : > { %v2803_v16 = vpop.permute.xlu0 %911 }
 0x121   : > { %v513_v46 = vpop.permute.xlu1 %512 }
 0x122   : > { %vm545_vm13 = vcmp.eq.s32.totalorder %v513_v46, %v2646_v53 }
 0x123   : > { %v561_v22 = vsel %vm545_vm13, 1.0, %v2333_v56  ;;  %2225 = vset.pattern.permute.xlu1 %v3442_v20  ;;  %vm738_vm13 = vcmp.eq.s32.totalorder %v2586_v29, %v2646_v53  ;;  %v658_v29 = vsel %vm642_vm9, 1.0, %v2333_v56 }
 0x124   : > { %v577_v11 = vadd.f32 %v561_v22, %v481_v62  ;;  %338 = vperm.xlu1 %2225, %v2502_v15   ;;  %v475_v62 = vadd.f32 %v459_v59, %v363_v23  ;;  %v651_v59 = vsel %vm635_vm5, 1.0, %v2333_v56 }
 0x125   : > { %v780_v5 = vpop.permute.xlu0 %779 }
 0x126   : > { %vm826_vm2 = vcmp.eq.s32.totalorder %v780_v5, %v2646_v53  ;;  %v2820_v26 = vpop.permute.xlu1 %698  ;;  %v2822_v46 = vadd.f32 %v657_v49, %v577_v11  ;;  %v938_v49 = vsel %vm922_vm1, 1.0, %v2333_v56  ;;  %v571_v40 = vadd.f32 %v555_v28, %v475_v62 }
 0x127   : > { %v842_v22 = vsel %vm826_vm2, 1.0, %v2333_v56  ;;  %v460_v62 = vsel %vm444_vm8, 1.0, %v2333_v56  ;;  %vm827_vm1 = vcmp.eq.s32.totalorder %v2714_v47, %v2646_v53  ;;  %v3446_v47 = vmov 4  }
 0x128   : > { %v858_v27 = vadd.f32 %v842_v22, %v2710_v43  ;;  %2226 = vset.pattern.permute.xlu1 %v3443_v48  ;;  %v466_v43 = vsel %vm450_vm3, 1.0, %v2333_v56  ;;  %v476_v33 = vadd.f32 %v460_v62, %v364_v34  ;;  %vm923_vm3 = vcmp.eq.s32.totalorder %v2743_v38, %v2646_v53 }
 0x129   : > { %v786_v11 = vpop.permute.xlu0 %785  ;;  %620 = vperm.xlu1 %2226, %v2480_v12   ;;  %v940_v38 = vsel %vm924_vm4, 1.0, %v2333_v56 }
 0x12a   : > { %v954_v3 = vadd.f32 %v938_v49, %v858_v27  ;;  %v3444_v27 = vmov 5   ;;  %vm828_vm2 = vcmp.eq.s32.totalorder %v786_v11, %v2646_v53 }
 0x12b   : > { %v324_v5 = vpop.permute.xlu1 %323 }
 0x12c   : > { %vm354_vm10 = vcmp.eq.s32.totalorder %v324_v5, %v2646_v53  ;;  %v1050_v23 = vadd.f32 %v1034_v42, %v954_v3  ;;  %v667_v42 = vadd.f32 %v651_v59, %v571_v40  ;;  %v754_v5 = vsel %vm738_vm13, 1.0, %v2333_v56 }
 0x12d   : > { %v370_v22 = vsel %vm354_vm10, 1.0, %v2333_v56  ;;  %2227 = vset.pattern.permute.xlu1 %v3444_v27  ;;  %v2854_v28 = vpop.permute.xlu0 %800  ;;  %v747_v40 = vsel %vm731_vm14, 1.0, %v2333_v56  ;;  %v652_v59 = vsel %vm636_vm15, 1.0, %v2333_v56  ;;  %vm829_vm10 = vcmp.eq.s32.totalorder %v2779_v0, %v2646_v53 }
 0x12e   : > { %v482_v49 = vadd.f32 %v466_v43, %v370_v22  ;;  %806 = vperm.xlu1 %2227, %v2458_v9   ;;  %v1066_v3 = vmul.f32 0.125, %v1050_v23  ;;  %v556_v43 = vsel %vm540_vm11, 1.0, %v2333_v56  ;;  %v3445_v22 = vmov 2  }
 0x12f   : > { %v572_v52 = vadd.f32 %v556_v43, %v476_v33  ;;  %v939_v43 = vsel %vm923_vm3, 1.0, %v2333_v56  ;;  %vm930_vm13 = vcmp.eq.s32.totalorder %v2782_v19, %v2646_v53  ;;  %vm925_vm14 = vcmp.eq.s32.totalorder %v2771_v18, %v2646_v53 }
 0x130   : > { %v578_v60 = vadd.f32 %v562_v24, %v482_v49  ;;  %1976 = vmatprep.mubr.msk.f32.mxu0 %vm1097_vm12, %v1066_v3  ;;  %v2880_v4 = vpop.permute.xlu1 %605  ;;  %v763_v24 = vadd.f32 %v747_v40, %v667_v42  ;;  %v844_v42 = vsel %vm828_vm2, 1.0, %v2333_v56  ;;  %v946_v19 = vsel %vm930_vm13, 1.0, %v2333_v56 }
 0x131   : > { %v804_v23 = vpop.permute.xlu0 %803  ;;  %v668_v62 = vadd.f32 %v652_v59, %v572_v52  ;;  %vm352_vm15 = vcmp.eq.s32.totalorder %v2626_v45, %v2646_v53  ;;  %v941_v18 = vsel %vm925_vm14, 1.0, %v2333_v56  ;;  %vm640_vm3 = vcmp.eq.s32.totalorder %v2880_v4, %v2646_v53 }
 0x132   : > { %v674_v30 = vadd.f32 %v658_v29, %v578_v60  ;;  %2228 = vset.pattern.permute.xlu1 %v3445_v22  ;;  %v748_v29 = vsel %vm732_vm0, 1.0, %v2333_v56  ;;  %v843_v60 = vsel %vm827_vm1, 1.0, %v2333_v56  ;;  %vm834_vm7 = vcmp.eq.s32.totalorder %v804_v23, %v2646_v53 }
 0x133   : > { %527 = vperm.xlu1 %2228, %v2485_v13   ;;  %v859_v25 = vadd.f32 %v843_v60, %v763_v24  ;;  %v764_v11 = vadd.f32 %v748_v29, %v668_v62  ;;  %v563_v24 = vsel %vm547_vm6, 1.0, %v2333_v56  ;;  %vm448_vm0 = vcmp.eq.s32.totalorder %v2749_v39, %v2646_v53 }
 0x134   : > { %v770_v49 = vadd.f32 %v754_v5, %v674_v30  ;;  %vm544_vm1 = vcmp.eq.s32.totalorder %v2785_v7, %v2646_v53  ;;  %v464_v39 = vsel %vm448_vm0, 1.0, %v2333_v56  ;;  %vm833_vm6 = vcmp.eq.s32.totalorder %v2854_v28, %v2646_v53 }
 0x135   : > { %v2892_v3 = vpop.permute.xlu1 %791  ;;  %v2894_v34 = vpop.permute.xlu0 %821  ;;  %v955_v40 = vadd.f32 %v939_v43, %v859_v25  ;;  %v860_v59 = vadd.f32 %v844_v42, %v764_v11  ;;  %v845_v43 = vsel %vm829_vm10, 1.0, %v2333_v56  ;;  %vm542_vm10 = vcmp.eq.s32.totalorder %v2723_v58, %v2646_v53 }
 0x136   : > { %vm734_vm14 = vcmp.eq.s32.totalorder %v2794_v14, %v2646_v53  ;;  %vm830_vm0 = vcmp.eq.s32.totalorder %v2892_v3, %v2646_v53 }
 0x137   : > { %2229 = vset.pattern.permute.xlu1 %v3446_v47  ;;  %v956_v29 = vadd.f32 %v940_v38, %v860_v59  ;;  %v750_v14 = vsel %vm734_vm14, 1.0, %v2333_v56 }
 0x138   : > { %713 = vperm.xlu1 %2229, %v2666_v63  }
 0x13a   : > { %v975_v5 = vpop.permute.xlu0 %974  ;;  %v327_v33 = vpop.permute.xlu1 %326 }
 0x13b   : > { %vm1019_vm5 = vcmp.eq.s32.totalorder %v975_v5, %v2646_v53  ;;  %vm355_vm8 = vcmp.eq.s32.totalorder %v327_v33, %v2646_v53 }
 0x13c   : > { %v1035_v30 = vsel %vm1019_vm5, 1.0, %v2333_v56  ;;  %2230 = vset.pattern.permute.xlu1 %v3445_v22  ;;  %v850_v22 = vsel %vm834_vm7, 1.0, %v2333_v56  ;;  %v371_v60 = vsel %vm355_vm8, 1.0, %v2333_v56  ;;  %vm350_vm8 = vcmp.eq.s32.totalorder %v2615_v41, %v2646_v53 }
 0x13d   : > { %v1051_v50 = vadd.f32 %v1035_v30, %v955_v40  ;;  %530 = vperm.xlu1 %2230, %v2502_v15   ;;  %v866_v5 = vadd.f32 %v850_v22, %v770_v49  ;;  %v861_v49 = vadd.f32 %v845_v43, %v2725_v61  ;;  %v368_v30 = vsel %vm352_vm15, 1.0, %v2333_v56 }
 0x13e   : > { %v978_v52 = vpop.permute.xlu0 %977  ;;  %v480_v7 = vadd.f32 %v464_v39, %v368_v30  ;;  %v656_v22 = vsel %vm640_vm3, 1.0, %v2333_v56  ;;  %v558_v41 = vsel %vm542_vm10, 1.0, %v2333_v56  ;;  %vm351_vm3 = vcmp.eq.s32.totalorder %v2685_v32, %v2646_v53 }
 0x13f   : > { %v1067_v62 = vmul.f32 0.125, %v1051_v50  ;;  %vm1020_vm9 = vcmp.eq.s32.totalorder %v978_v52, %v2646_v53  ;;  %v423_v10 = vpop.permute.xlu1 %422  ;;  %v962_v45 = vadd.f32 %v946_v19, %v866_v5  ;;  %v849_v19 = vsel %vm833_vm6, 1.0, %v2333_v56 }
 0x140   : > { %v1036_v23 = vsel %vm1020_vm9, 1.0, %v2333_v56  ;;  %vm451_vm11 = vcmp.eq.s32.totalorder %v423_v10, %v2646_v53  ;;  %vm446_vm9 = vcmp.eq.s32.totalorder %v2669_v2, %v2646_v53  ;;  %vm357_vm6 = vcmp.eq.s32.totalorder %v2640_v51, %v2646_v53 }
 0x141   : > { %v1052_v25 = vadd.f32 %v1036_v23, %v956_v29  ;;  %v467_v42 = vsel %vm451_vm11, 1.0, %v2333_v56  ;;  %2231 = vset.pattern.permute.xlu1 %v3446_v47  ;;  %1977 = vmatmul.mubr.msk.f32.vlgmr.msra.gmra.mrb[0].mxu0 %vm1097_vm12, %v1067_v62  ;;  %v957_v62 = vadd.f32 %v941_v18, %v861_v49  ;;  %vm638_vm11 = vcmp.eq.s32.totalorder %v2755_v44, %v2646_v53 }
 0x142   : > { %v483_v11 = vadd.f32 %v467_v42, %v371_v60  ;;  %v2928_v0 = vpop.permute.xlu0 %992  ;;  %716 = vperm.xlu1 %2231, %v2480_v12   ;;  %v654_v58 = vsel %vm638_vm11, 1.0, %v2333_v56  ;;  %v367_v32 = vsel %vm351_vm3, 1.0, %v2333_v56  ;;  %v373_v51 = vsel %vm357_vm6, 1.0, %v2333_v56 }
 0x143   : > { %v1068_v33 = vmul.f32 0.125, %v1052_v25  ;;  %vm927_vm11 = vcmp.eq.s32.totalorder %v2777_v57, %v2646_v53 }
 0x144   : > { %v2935_v40 = vpop.permute.xlu1 %794  ;;  %v2937_v59 = vadd.f32 %v563_v24, %v483_v11  ;;  %v560_v24 = vsel %vm544_vm1, 1.0, %v2333_v56 }
 0x145   : > { %1979 = vmatprep.mubr.msk.f32.mxu0 %vm1097_vm12, %v1068_v33  ;;  %v576_v60 = vadd.f32 %v560_v24, %v480_v7 }
 0x146   : > { %v996_v38 = vpop.permute.xlu0 %995  ;;  %2232 = vset.pattern.permute.xlu1 %v3442_v20 }
 0x147   : > { %vm1026_vm2 = vcmp.eq.s32.totalorder %v996_v38, %v2646_v53  ;;  %341 = vperm.xlu1 %2232, %v2508_v17   ;;  %v672_v42 = vadd.f32 %v656_v22, %v576_v60  ;;  %v3447_v38 = vmov 1  }
 0x148   : > { %v1042_v50 = vsel %vm1026_vm2, 1.0, %v2333_v56  ;;  %vm447_vm2 = vcmp.eq.s32.totalorder %v2698_v37, %v2646_v53  ;;  %v3449_v37 = vmov 6  }
 0x149   : > { %v981_v61 = vpop.permute.xlu1 %980  ;;  %v1058_v52 = vadd.f32 %v1042_v50, %v962_v45  ;;  %v366_v45 = vsel %vm350_vm8, 1.0, %v2333_v56  ;;  %v3448_v50 = vmov 7   ;;  %vm735_vm8 = vcmp.eq.s32.totalorder %v2820_v26, %v2646_v53 }
 0x14a   : > { %vm1021_vm4 = vcmp.eq.s32.totalorder %v981_v61, %v2646_v53 }
 0x14b   : > { %v1037_v29 = vsel %vm1021_vm4, 1.0, %v2333_v56  ;;  %2234 = vset.pattern.permute.xlu1 %v3443_v48  ;;  %v1074_v10 = vmul.f32 0.125, %v1058_v52  ;;  %vm543_vm4 = vcmp.eq.s32.totalorder %v2737_v36, %v2646_v53 }
 0x14c   : > { %v1053_v23 = vadd.f32 %v1037_v29, %v957_v62  ;;  %623 = vperm.xlu1 %2234, %v2485_v13   ;;  %v846_v62 = vsel %vm830_vm0, 1.0, %v2333_v56  ;;  %v559_v36 = vsel %vm543_vm4, 1.0, %v2333_v56  ;;  %vm358_vm4 = vcmp.eq.s32.totalorder %v2649_v54, %v2646_v53 }
 0x14d   : > { %1988 = vmatprep.mubr.msk.f32.mxu1 %vm1097_vm12, %v1074_v10  ;;  %v463_v10 = vsel %vm447_vm2, 1.0, %v2333_v56  ;;  %vm1025_vm2 = vcmp.eq.s32.totalorder %v2928_v0, %v2646_v53  ;;  %v374_v0 = vsel %vm358_vm4, 1.0, %v2333_v56 }
 0x14e   : > { %v1069_v4 = vmul.f32 0.125, %v1053_v23  ;;  %v702_v25 = vpop.permute.xlu1 %701  ;;  %v479_v60 = vadd.f32 %v463_v10, %v367_v32 }
 0x14f   : > { %vm736_vm5 = vcmp.eq.s32.totalorder %v702_v25, %v2646_v53 }
 0x150   : > { %v752_v11 = vsel %vm736_vm5, 1.0, %v2333_v56  ;;  %2235 = vset.pattern.permute.xlu1 %v3444_v27  ;;  %1980 = vmatmul.mubr.msk.f32.gmra.mrb[2].mxu0 %vm1097_vm12, %v1069_v4 }
 0x151   : > { %v2967_v43 = vadd.f32 %v752_v11, %v672_v42  ;;  %809 = vperm.xlu1 %2235, %v2666_v63   ;;  %v575_v42 = vadd.f32 %v559_v36, %v479_v60  ;;  %v751_v11 = vsel %vm735_vm8, 1.0, %v2333_v56  ;;  %v2260_v60 = vld [vmem:[%s2431_s17 + $0x78] sm:$0xff] }
 0x153   : > { %v888_v5 = vpop.permute.xlu1 %887 }
 0x154   : > { %vm926_vm1 = vcmp.eq.s32.totalorder %v888_v5, %v2646_v53 }
 0x155   : > { %2236 = vset.pattern.permute.xlu1 %v3442_v20  ;;  %v942_v3 = vsel %vm926_vm1, 1.0, %v2333_v56 }
 0x156   : > { %344 = vperm.xlu1 %2236, %v2545_v21  }
 0x158   : > { %v705_v33 = vpop.permute.xlu1 %704 }
 0x159   : > { %vm737_vm7 = vcmp.eq.s32.totalorder %v705_v33, %v2646_v53 }
 0x15a   : > { %v753_v49 = vsel %vm737_vm7, 1.0, %v2333_v56  ;;  %2237 = vset.pattern.permute.xlu1 %v3447_v38  ;;  %vm639_vm7 = vcmp.eq.s32.totalorder %v2773_v55, %v2646_v53 }
 0x15b   : > { %v769_v18 = vadd.f32 %v753_v49, %v2822_v46  ;;  %440 = vperm.xlu1 %2237, %v2545_v21   ;;  %v462_v46 = vsel %vm446_vm9, 1.0, %v2333_v56  ;;  %v655_v4 = vsel %vm639_vm7, 1.0, %v2333_v56  ;;  %vm831_vm9 = vcmp.eq.s32.totalorder %v2935_v40, %v2646_v53 }
 0x15c   : > { %v478_v30 = vadd.f32 %v462_v46, %v366_v45  ;;  %v671_v26 = vadd.f32 %v655_v4, %v575_v42  ;;  %v847_v33 = vsel %vm831_vm9, 1.0, %v2333_v56 }
 0x15d   : > { %v330_v20 = vpop.permute.xlu1 %329  ;;  %v2984_v28 = vadd.f32 %v849_v19, %v769_v18 }
 0x15e   : > { %vm356_vm13 = vcmp.eq.s32.totalorder %v330_v20, %v2646_v53  ;;  %v574_v44 = vadd.f32 %v558_v41, %v478_v30  ;;  %v767_v40 = vadd.f32 %v751_v11, %v671_v26 }
 0x15f   : > { %2239 = vset.pattern.permute.xlu1 %v3444_v27  ;;  %v372_v39 = vsel %vm356_vm13, 1.0, %v2333_v56  ;;  %vm739_vm13 = vcmp.eq.s32.totalorder %v2592_v31, %v2646_v53 }
 0x160   : > { %812 = vperm.xlu1 %2239, %v2480_v12   ;;  %v670_v52 = vadd.f32 %v654_v58, %v574_v44  ;;  %v863_v49 = vadd.f32 %v847_v33, %v767_v40  ;;  %v755_v57 = vsel %vm739_vm13, 1.0, %v2333_v56  ;;  %vm931_vm13 = vcmp.eq.s32.totalorder %v2787_v1, %v2646_v53 }
 0x162   : > { %v426_v2 = vpop.permute.xlu1 %425  ;;  %v766_v7 = vadd.f32 %v750_v14, %v670_v52 }
 0x163   : > { %vm452_vm15 = vcmp.eq.s32.totalorder %v426_v2, %v2646_v53  ;;  %v2257_v2 = vld [vmem:[%s2431_s17 + $0x60] sm:$0xff] }
 0x164   : > { %v468_v12 = vsel %vm452_vm15, 1.0, %v2333_v56  ;;  %2240 = vset.pattern.permute.xlu1 %v3448_v50 }
 0x165   : > { %v3005_v61 = vadd.f32 %v468_v12, %v372_v39  ;;  %998 = vperm.xlu1 %2240, %v2458_v9   ;;  %v862_v9 = vadd.f32 %v846_v62, %v766_v7  ;;  %v2258_v12 = vld [vmem:[%s2431_s17 + $0x68] sm:$0xff]  ;;  %v1041_v62 = vsel %vm1025_vm2, 1.0, %v2333_v56  ;;  %vm456_vm2 = vcmp.eq.s32.totalorder %v2683_v6, %v2646_v53 }
 0x167   : > { %v3010_v24 = vpop.permute.xlu1 %797  ;;  %v958_v22 = vadd.f32 %v942_v3, %v862_v9 }
 0x168   : > { %vm832_vm6 = vcmp.eq.s32.totalorder %v3010_v24, %v2646_v53 }
 0x169   : > { %2241 = vset.pattern.permute.xlu1 %v3446_v47  ;;  %v848_v54 = vsel %vm832_vm6, 1.0, %v2333_v56 }
 0x16a   : > { %719 = vperm.xlu1 %2241, %v2485_v13   ;;  %v864_v24 = vadd.f32 %v848_v54, %v2967_v43 }
 0x16c   : > { %v984_v29 = vpop.permute.xlu1 %983 }
 0x16d   : > { %vm1022_vm5 = vcmp.eq.s32.totalorder %v984_v29, %v2646_v53 }
 0x16e   : > { %v1038_v13 = vsel %vm1022_vm5, 1.0, %v2333_v56  ;;  %2242 = vset.pattern.permute.xlu1 %v3449_v37 }
 0x16f   : > { %v1054_v23 = vadd.f32 %v1038_v13, %v958_v22  ;;  %905 = vperm.xlu1 %2242, %v2666_v63  }
 0x171   : > { %v1070_v55 = vmul.f32 0.125, %v1054_v23  ;;  %v429_v25 = vpop.permute.xlu1 %428 }
 0x172   : > { %vm453_vm10 = vcmp.eq.s32.totalorder %v429_v25, %v2646_v53 }
 0x173   : > { %v469_v63 = vsel %vm453_vm10, 1.0, %v2333_v56  ;;  %2244 = vset.pattern.permute.xlu1 %v3446_v47  ;;  %1982 = vmatprep.mubr.msk.f32.mxu0 %vm1097_vm12, %v1070_v55  ;;  %vm455_vm10 = vcmp.eq.s32.totalorder %v2678_v8, %v2646_v53  ;;  %v1308_v8 = vld [vmem:[%s3417_s3 + $0x8] sm:$0xff] }
 0x174   : > { %v485_v5 = vadd.f32 %v469_v63, %v373_v51  ;;  %722 = vperm.xlu1 %2244, %v2502_v15   ;;  %v943_v15 = vsel %vm927_vm11, 1.0, %v2333_v56  ;;  %v471_v43 = vsel %vm455_vm10, 1.0, %v2333_v56 }
 0x175   : > { %v959_v31 = vadd.f32 %v943_v15, %v863_v49 }
 0x176   : > { %v615_v19 = vpop.permute.xlu1 %614 }
 0x177   : > { %vm643_vm14 = vcmp.eq.s32.totalorder %v615_v19, %v2646_v53 }
 0x178   : > { %v659_v38 = vsel %vm643_vm14, 1.0, %v2333_v56  ;;  %2245 = vset.pattern.permute.xlu1 %v3443_v48 }
 0x179   : > { %v675_v18 = vadd.f32 %v659_v38, %v2937_v59  ;;  %629 = vperm.xlu1 %2245, %v2508_v17  }
 0x17b   : > { %v987_v20 = vpop.permute.xlu1 %986  ;;  %v3057_v45 = vadd.f32 %v755_v57, %v675_v18 }
 0x17c   : > { %vm1023_vm15 = vcmp.eq.s32.totalorder %v987_v20, %v2646_v53 }
 0x17d   : > { %v1039_v46 = vsel %vm1023_vm15, 1.0, %v2333_v56  ;;  %2246 = vset.pattern.permute.xlu1 %v3444_v27 }
 0x17e   : > { %v1055_v41 = vadd.f32 %v1039_v46, %v959_v31  ;;  %815 = vperm.xlu1 %2246, %v2257_v2   ;;  %v3450_v46 = vld [vmem:[#allocation5_spill] sm:$0xff] }
 0x180   : > { %v1071_v30 = vmul.f32 0.125, %v1055_v41  ;;  %v522_v59 = vpop.permute.xlu1 %521 }
 0x181   : > { %vm548_vm0 = vcmp.eq.s32.totalorder %v522_v59, %v2646_v53 }
 0x182   : > { %v564_v17 = vsel %vm548_vm0, 1.0, %v2333_v56  ;;  %2247 = vset.pattern.permute.xlu1 %v3443_v48  ;;  %1983 = vmatmul.mubr.msk.f32.gmra.mrb[4].mxu0 %vm1097_vm12, %v1071_v30  ;;  %v2259_v48 = vld [vmem:[%s2431_s17 + $0x70] sm:$0xff]  ;;  %vm647_vm0 = vcmp.eq.s32.totalorder %v2735_v35, %v2646_v53  ;;  %v472_v35 = vsel %vm456_vm2, 1.0, %v2333_v56  ;;  %s270_s17 = sand.u32 1, %s2315_s25  }
 0x183   : > { %v580_v58 = vadd.f32 %v564_v17, %v3005_v61  ;;  %632 = vperm.xlu1 %2247, %v2545_v21   ;;  %v663_v20 = vsel %vm647_vm0, 1.0, %v2333_v56  ;;  %s1832_s21 = sshll.u32 %s270_s17, 7  ;;  %s3373_s16 = scalar_lea.sflag [#allocation3], %s270_s17 }
 0x184   : > { %s3343_s29 = scalar_lea.vmem [#allocation2], %s1832_s21 }
 0x185   : > { %v894_v39 = vpop.permute.xlu1 %893  ;;  %s1766_s9 = sshll.u32 %s3343_s29, 4  ;;  %s3367_s9 = int_to_ptr.vmem [resolvable:$true] %s1766_s9 }
 0x186   : > { %vm928_vm7 = vcmp.eq.s32.totalorder %v894_v39, %v2646_v53  ;;  %s2261_s28 = scalar_lea.vmem %s3367_s9, 2048  ;;  %p2268_p0 = scmp.lt.s32.totalorder %s3367_s9, %s2266_s19 }
 0x187   : > { %2248 = vset.pattern.permute.xlu1 %v3444_v27  ;;  %v944_v22 = vsel %vm928_vm7, 1.0, %v2333_v56  ;;  %p2262_p11 = scmp.ne.s32.totalorder %s3367_s9, %s2261_s28  ;;  %p2269_p1 = scmp.lt.s32.totalorder %s2267_s20, %s2261_s28 }
 0x188   : > { %818 = vperm.xlu1 %2248, %v2258_v12   ;;  %v960_v36 = vadd.f32 %v944_v22, %v864_v24 }
 0x189   : > { %p2263_p12 = pnand %p2262_p11, %p2415_p5  ;;  %p2270_p2 = por %p2269_p1, %p2268_p0 }
 0x18a   : > { %v525_v44 = vpop.permute.xlu1 %524 }
 0x18b   : > { %vm549_vm1 = vcmp.eq.s32.totalorder %v525_v44, %v2646_v53  ;;  %p2264_p13 = pneg %p2263_p12 }
 0x18c   : > { %v565_v14 = vsel %vm549_vm1, 1.0, %v2333_v56  ;;  %2249 = vset.pattern.permute.xlu1 %v3446_v47 }
 0x18d   : > { %v3074_v52 = vadd.f32 %v565_v14, %v485_v5  ;;  %725 = vperm.xlu1 %2249, %v2259_v48   ;;  %v947_v5 = vsel %vm931_vm13, 1.0, %v2333_v56  ;;  %p2271_p3 = pnand %p2270_p2, %p2264_p13 }
 0x18f   : > { %v897_v61 = vpop.permute.xlu1 %896 }
 0x190   : > { %vm929_vm3 = vcmp.eq.s32.totalorder %v897_v61, %v2646_v53 }
 0x191   : > { %v945_v7 = vsel %vm929_vm3, 1.0, %v2333_v56  ;;  %728 = vperm.xlu1 %2249, %v2545_v21   ;;  %vm552_vm3 = vcmp.eq.s32.totalorder %v3450_v46, %v2646_v53 }
 0x192   : > { %v961_v3 = vadd.f32 %v945_v7, %v2984_v28 }
 0x194   : > { %v1057_v47 = vadd.f32 %v1041_v62, %v961_v3  ;;  %v432_v9 = vpop.permute.xlu1 %431 }
 0x195   : > { %vm454_vm5 = vcmp.eq.s32.totalorder %v432_v9, %v2646_v53  ;;  %2251 = vset.pattern.permute.xlu1 %v3449_v37 }
 0x196   : > { %v470_v29 = vsel %vm454_vm5, 1.0, %v2333_v56  ;;  %914 = vperm.xlu1 %2251, %v2258_v12   ;;  %v1073_v25 = vmul.f32 0.125, %v1057_v47 }
 0x197   : > { %v486_v21 = vadd.f32 %v470_v29, %v374_v0 }
 0x199   : > { %v618_v28 = vpop.permute.xlu1 %617 }
 0x19a   : > { %vm644_vm8 = vcmp.eq.s32.totalorder %v618_v28, %v2646_v53  ;;  %2253 = vset.pattern.permute.xlu1 %v3448_v50  ;;  %v3452_v28 = vld [vmem:[#allocation7_spill] sm:$0xff] }
 0x19b   : > { %v660_v10 = vsel %vm644_vm8, 1.0, %v2333_v56  ;;  %1007 = vperm.xlu1 %2253, %v2257_v2   ;;  %v568_v2 = vsel %vm552_vm3, 1.0, %v2333_v56 }
 0x19c   : > { %v3098_v13 = vadd.f32 %v660_v10, %v580_v58 }
 0x19e   : > { %v990_v32 = vpop.permute.xlu1 %989 }
 0x19f   : > { %vm1024_vm9 = vcmp.eq.s32.totalorder %v990_v32, %v2646_v53  ;;  %2254 = vset.pattern.permute.xlu1 %v3444_v27  ;;  %v1307_v27 = vld [vmem:[%s3417_s3] sm:$0xff]  ;;  %v1002_v32 = vpop.permute.xlu0 %1001 }
 0x1a0   : > { %v1040_v23 = vsel %vm1024_vm9, 1.0, %v2333_v56  ;;  %824 = vperm.xlu1 %2254, %v2260_v60   ;;  %v3119_v63 = vpack.c.bf16 %v1308_v8, %v1307_v27  ;;  %v1311_v8 = vld [vmem:[%s3417_s3 + $0x20] sm:$0xff]  ;;  %vm1028_vm2 = vcmp.eq.s32.totalorder %v1002_v32, %v2646_v53 }
 0x1a1   : > { %v1056_v51 = vadd.f32 %v1040_v23, %v960_v36 }
 0x1a2   : > { %2089 = vmatprep.subr.bf16.mxu1 %v3119_v63 }
 0x1a3   : > { %v1072_v4 = vmul.f32 0.125, %v1056_v51  ;;  %v339_v55 = vpop.permute.xlu1 %338  ;;  %v1310_v51 = vld [vmem:[%s3417_s3 + $0x18] sm:$0xff] }
 0x1a4   : > { %vm359_vm11 = vcmp.eq.s32.totalorder %v339_v55, %v2646_v53  ;;  %2255 = vset.pattern.permute.xlu1 %v3449_v37  ;;  %v1005_v55 = vpop.permute.xlu0 %1004 }
 0x1a5   : > { %v375_v42 = vsel %vm359_vm11, 1.0, %v2333_v56  ;;  %917 = vperm.xlu1 %2255, %v2259_v48   ;;  %1985 = vmatprep.mubr.msk.f32.mxu0 %vm1097_vm12, %v1072_v4  ;;  %v3451_v48 = vld [vmem:[#allocation6_spill] sm:$0xff]  ;;  %vm933_vm11 = vcmp.eq.s32.totalorder %v3452_v28, %v2646_v53 }
 0x1a6   : > { %v487_v11 = vadd.f32 %v471_v43, %v375_v42  ;;  %1986 = vmatmul.mubr.msk.f32.gmra.mrb[6].mxu0 %vm1097_vm12, %v1073_v25  ;;  %vm553_vm9 = vcmp.eq.s32.totalorder %v3451_v48, %v2646_v53  ;;  %v949_v24 = vsel %vm933_vm11, 1.0, %v2333_v56 }
 0x1a7   : > { %v569_v9 = vsel %vm553_vm9, 1.0, %v2333_v56 }
 0x1a8   : > { %v621_v37 = vpop.permute.xlu1 %620 }
 0x1a9   : > { %920 = vperm.xlu1 %2255, %v2260_v60   ;;  %vm645_vm6 = vcmp.eq.s32.totalorder %v621_v37, %v2646_v53 }
 0x1aa   : > { %v661_v61 = vsel %vm645_vm6, 1.0, %v2333_v56 }
 0x1ab   : > { %v677_v0 = vadd.f32 %v661_v61, %v3074_v52 }
 0x1ad   : > { %2256 = vset.pattern.permute.xlu1 %v3448_v50  ;;  %v807_v26 = vpop.permute.xlu1 %806 }
 0x1ae   : > { %vm835_vm14 = vcmp.eq.s32.totalorder %v807_v26, %v2646_v53  ;;  %1016 = vperm.xlu1 %2256, %v2260_v60   ;;  %v1309_v60 = vld [vmem:[%s3417_s3 + $0x10] sm:$0xff] }
 0x1af   : > { %v851_v33 = vsel %vm835_vm14, 1.0, %v2333_v56  ;;  %v2092_v42 = vpack.c.bf16 %v1310_v51, %v1309_v60 }
 0x1b0   : > { %v867_v40 = vadd.f32 %v851_v33, %v3057_v45 }
 0x1b2   : > { %v528_v19 = vpop.permute.xlu1 %527  ;;  %v963_v49 = vadd.f32 %v947_v5, %v867_v40  ;;  %v1313_v40 = vld [vmem:[%s3417_s3 + $0x30] sm:$0xff] }
 0x1b3   : > { %vm550_vm15 = vcmp.eq.s32.totalorder %v528_v19, %v2646_v53  ;;  %v1314_v19 = vld [vmem:[%s3417_s3 + $0x38] sm:$0xff] }
 0x1b4   : > { %v566_v38 = vsel %vm550_vm15, 1.0, %v2333_v56 }
 0x1b5   : > { %v582_v15 = vadd.f32 %v566_v38, %v486_v21 }
 0x1b7   : > { %v714_v1 = vpop.permute.xlu1 %713 }
 0x1b8   : > { %vm740_vm15 = vcmp.eq.s32.totalorder %v714_v1, %v2646_v53  ;;  %v2100_v1 = vpack.c.bf16 %v1314_v19, %v1313_v40 }
 0x1b9   : > { %v756_v27 = vsel %vm740_vm15, 1.0, %v2333_v56 }
 0x1ba   : > { %v772_v26 = vadd.f32 %v756_v27, %v3098_v13  ;;  %v1044_v13 = vsel %vm1028_vm2, 1.0, %v2333_v56 }
 0x1bc   : > { %v531_v18 = vpop.permute.xlu1 %530 }
 0x1bd   : > { %vm551_vm1 = vcmp.eq.s32.totalorder %v531_v18, %v2646_v53 }
 0x1be   : > { %v567_v50 = vsel %vm551_vm1, 1.0, %v2333_v56  ;;  %vm1029_vm1 = vcmp.eq.s32.totalorder %v1005_v55, %v2646_v53 }
 0x1bf   : > { %v583_v57 = vadd.f32 %v567_v50, %v487_v11  ;;  %v1312_v11 = vld [vmem:[%s3417_s3 + $0x28] sm:$0xff]  ;;  %v1045_v38 = vsel %vm1029_vm1, 1.0, %v2333_v56 }
 0x1c0   : > { %v2096_v5 = vpack.c.bf16 %v1312_v11, %v1311_v8 }
 0x1c1   : > { %v717_v45 = vpop.permute.xlu1 %716  ;;  %v3136_v31 = vadd.f32 %v663_v20, %v583_v57 }
 0x1c2   : > { %vm741_vm8 = vcmp.eq.s32.totalorder %v717_v45, %v2646_v53 }
 0x1c3   : > { %v757_v3 = vsel %vm741_vm8, 1.0, %v2333_v56  ;;  %vm840_vm8 = vcmp.eq.s32.totalorder %v2894_v34, %v2646_v53 }
 0x1c4   : > { %v773_v54 = vadd.f32 %v757_v3, %v677_v0 }
 0x1c6   : > { %v342_v41 = vpop.permute.xlu1 %341 }
 0x1c7   : > { %vm360_vm4 = vcmp.eq.s32.totalorder %v342_v41, %v2646_v53 }
 0x1c8   : > { %v376_v30 = vsel %vm360_vm4, 1.0, %v2333_v56 }
 0x1c9   : > { %v488_v59 = vadd.f32 %v472_v35, %v376_v30 }
 0x1cb   : > { %v624_v17 = vpop.permute.xlu1 %623  ;;  %v3146_v58 = vadd.f32 %v568_v2, %v488_v59 }
 0x1cc   : > { %vm646_vm5 = vcmp.eq.s32.totalorder %v624_v17, %v2646_v53 }
 0x1cd   : > { %v662_v6 = vsel %vm646_vm5, 1.0, %v2333_v56  ;;  %vm934_vm5 = vcmp.eq.s32.totalorder %v2803_v16, %v2646_v53 }
 0x1ce   : > { %v3150_v39 = vadd.f32 %v662_v6, %v582_v15  ;;  %v950_v17 = vsel %vm934_vm5, 1.0, %v2333_v56 }
 0x1d0   : > { %v810_v12 = vpop.permute.xlu1 %809 }
 0x1d1   : > { %vm836_vm0 = vcmp.eq.s32.totalorder %v810_v12, %v2646_v53 }
 0x1d2   : > { %v852_v37 = vsel %vm836_vm0, 1.0, %v2333_v56 }
 0x1d5   : > { %v345_v44 = vpop.permute.xlu1 %344 }
 0x1d6   : > { %vm361_vm7 = vcmp.eq.s32.totalorder %v345_v44, %v2646_v53 }
 0x1d7   : > { %v377_v62 = vsel %vm361_vm7, 1.0, %v2333_v56 }
 0x1da   : > { %v441_v14 = vpop.permute.xlu1 %440 }
 0x1db   : > { %vm457_vm10 = vcmp.eq.s32.totalorder %v441_v14, %v2646_v53 }
 0x1dc   : > { %v473_v7 = vsel %vm457_vm10, 1.0, %v2333_v56 }
 0x1dd   : > { %v489_v47 = vadd.f32 %v473_v7, %v377_v62  ;;  %v856_v62 = vsel %vm840_vm8, 1.0, %v2333_v56 }
 0x1df   : > { %v813_v29 = vpop.permute.xlu1 %812  ;;  %v3164_v21 = vadd.f32 %v569_v9, %v489_v47 }
 0x1e0   : > { %vm837_vm13 = vcmp.eq.s32.totalorder %v813_v29, %v2646_v53 }
 0x1e1   : > { %v853_v10 = vsel %vm837_vm13, 1.0, %v2333_v56 }
 0x1e2   : > { %v869_v22 = vadd.f32 %v853_v10, %v773_v54  ;;  %v1011_v54 = vpop.permute.xlu0 %1010 }
 0x1e4   : > { %v965_v36 = vadd.f32 %v949_v24, %v869_v22  ;;  %v999_v23 = vpop.permute.xlu1 %998 }
 0x1e5   : > { %vm1027_vm14 = vcmp.eq.s32.totalorder %v999_v23, %v2646_v53 }
 0x1e6   : > { %v1043_v52 = vsel %vm1027_vm14, 1.0, %v2333_v56  ;;  %v1061_v18 = vadd.f32 %v1045_v38, %v965_v36  ;;  %vm1031_vm14 = vcmp.eq.s32.totalorder %v1011_v54, %v2646_v53 }
 0x1e7   : > { %v1059_v4 = vadd.f32 %v1043_v52, %v963_v49  ;;  %v868_v49 = vadd.f32 %v852_v37, %v772_v26  ;;  %v1047_v32 = vsel %vm1031_vm14, 1.0, %v2333_v56 }
 0x1e8   : > { %v1077_v45 = vmul.f32 0.125, %v1061_v18 }
 0x1e9   : > { %v1075_v25 = vmul.f32 0.125, %v1059_v4  ;;  %v720_v43 = vpop.permute.xlu1 %719  ;;  %v1014_v4 = vpop.permute.xlu0 %1013 }
 0x1ea   : > { %vm742_vm4 = vcmp.eq.s32.totalorder %v720_v43, %v2646_v53  ;;  %vm1032_vm2 = vcmp.eq.s32.totalorder %v1014_v4, %v2646_v53 }
 0x1eb   : > { %1989 = vmatmul.mubr.msk.f32.vlgmr.msra.gmra.mrb[0].mxu1 %vm1097_vm12, %v1075_v25  ;;  %v758_v41 = vsel %vm742_vm4, 1.0, %v2333_v56  ;;  %v1048_v26 = vsel %vm1032_vm2, 1.0, %v2333_v56 }
 0x1ec   : > { %2091 = vmatpush3.bf16.msra.mxu1 %v3119_v63  ;;  %v774_v2 = vadd.f32 %v758_v41, %v3150_v39 }
 0x1ed   : > { %2093 = vmatprep.subr.bf16.mxu1 %v2092_v42 }
 0x1ee   : > { %v906_v33 = vpop.permute.xlu1 %905 }
 0x1ef   : > { %vm932_vm3 = vcmp.eq.s32.totalorder %v906_v33, %v2646_v53 }
 0x1f0   : > { %v948_v63 = vsel %vm932_vm3, 1.0, %v2333_v56  ;;  %2095 = vmatpush3.bf16.msra.mxu1 %v2092_v42 }
 0x1f1   : > { %v964_v15 = vadd.f32 %v948_v63, %v868_v49  ;;  %2097 = vmatprep.subr.bf16.mxu1 %v2096_v5 }
 0x1f3   : > { %v1060_v50 = vadd.f32 %v1044_v13, %v964_v15  ;;  %v723_v57 = vpop.permute.xlu1 %722  ;;  %v3251_v13 = vld [vmem:[%s3416_s2] ss:$0 sm:$0xff] }
 0x1f4   : > { %2099 = vmatpush3.bf16.msra.mxu1 %v2096_v5  ;;  %vm743_vm10 = vcmp.eq.s32.totalorder %v723_v57, %v2646_v53 }
 0x1f5   : > { %v1076_v20 = vmul.f32 0.125, %v1060_v50  ;;  %2101 = vmatprep.subr.bf16.mxu1 %v2100_v1  ;;  %v759_v3 = vsel %vm743_vm10, 1.0, %v2333_v56 }
 0x1f6   : > { %v775_v34 = vadd.f32 %v759_v3, %v3136_v31 }
 0x1f7   : > { %1991 = vmatprep.mubr.msk.f32.mxu1 %vm1097_vm12, %v1076_v20 }
 0x1f8   : > { %1992 = vmatmul.mubr.msk.f32.gmra.mrb[2].mxu1 %vm1097_vm12, %v1077_v45  ;;  %v630_v46 = vpop.permute.xlu1 %629 }
 0x1f9   : > { %2103 = vmatpush3.bf16.msra.mxu1 %v2100_v1  ;;  %vm648_vm7 = vcmp.eq.s32.totalorder %v630_v46, %v2646_v53 }
 0x1fa   : > { %v664_v14 = vsel %vm648_vm7, 1.0, %v2333_v56  ;;  %vm1542_vm7 = vcmask 261120  }
 0x1fb   : > { %v680_v16 = vadd.f32 %v664_v14, %v3146_v58 }
 0x1fd   : > { %v816_v35 = vpop.permute.xlu1 %815 }
 0x1fe   : > { %vm838_vm6 = vcmp.eq.s32.totalorder %v816_v35, %v2646_v53 }
 0x1ff   : > { %v854_v30 = vsel %vm838_vm6, 1.0, %v2333_v56 }
 0x200   : > { %v870_v59 = vadd.f32 %v854_v30, %v774_v2 }
 0x202   : > { %v633_v6 = vpop.permute.xlu1 %632  ;;  %v966_v12 = vadd.f32 %v950_v17, %v870_v59 }
 0x203   : > { %vm649_vm0 = vcmp.eq.s32.totalorder %v633_v6, %v2646_v53 }
 0x204   : > { %v665_v42 = vsel %vm649_vm0, 1.0, %v2333_v56 }
 0x205   : > { %v681_v37 = vadd.f32 %v665_v42, %v3164_v21 }
 0x207   : > { %v819_v44 = vpop.permute.xlu1 %818 }
 0x208   : > { %vm839_vm11 = vcmp.eq.s32.totalorder %v819_v44, %v2646_v53 }
 0x209   : > { %v855_v9 = vsel %vm839_vm11, 1.0, %v2333_v56 }
 0x20a   : > { %v871_v28 = vadd.f32 %v855_v9, %v775_v34  ;;  %v1534_v9 = vld [vmem:[%s3419_s5 + $0x18] sm:$0xff] }
 0x20c   : > { %v726_v48 = vpop.permute.xlu1 %725 }
 0x20d   : > { %vm744_vm9 = vcmp.eq.s32.totalorder %v726_v48, %v2646_v53 }
 0x20e   : > { %v760_v39 = vsel %vm744_vm9, 1.0, %v2333_v56 }
 0x20f   : > { %v776_v61 = vadd.f32 %v760_v39, %v680_v16 }
 0x210   : > { %v729_v7 = vpop.permute.xlu1 %728 }
 0x211   : > { %v872_v47 = vadd.f32 %v856_v62, %v776_v61  ;;  %vm745_vm1 = vcmp.eq.s32.totalorder %v729_v7, %v2646_v53  ;;  %v1531_v62 = vld [vmem:[%s3419_s5] sm:$0xff]  ;;  %v1532_v7 = vld [vmem:[%s3419_s5 + $0x8] sm:$0xff] }
 0x212   : > { %v761_v8 = vsel %vm745_vm1, 1.0, %v2333_v56  ;;  %v2104_v3 = vpack.c.bf16 %v1532_v7, %v1531_v62 }
 0x213   : > { %v777_v19 = vadd.f32 %v761_v8, %v681_v37 }
 0x214   : > { %v1978_v58 = vpop.f32.mrb[0].mxu0  ;;  %2105 = vmatprep.subr.bf16.mxu0 %v2104_v3 }
 0x215   : > { %v1212_v0 = vpop.f32.mrb[1].mxu0  ;;  %v915_v29 = vpop.permute.xlu1 %914  ;;  %v1218_v57 = vadd.f32 %v1978_v58, %v3251_v13  ;;  %2107 = vmatpush3.bf16.msra.mxu0 %v2104_v3 }
 0x216   : > { %vm935_vm13 = vcmp.eq.s32.totalorder %v915_v29, %v2646_v53  ;;  %v1213_v1 = vadd.f32 %v3251_v13, %v1212_v0 }
 0x217   : > { %v951_v10 = vsel %vm935_vm13, 1.0, %v2333_v56  ;;  %v1292_v41 = vmax.f32 %v1218_v57, 0.0 }
 0x218   : > { %v967_v22 = vadd.f32 %v951_v10, %v871_v28  ;;  %v1291_v45 = vmax.f32 %v1213_v1, 0.0 }
 0x21a   : > { %v1008_v24 = vpop.permute.xlu1 %1007  ;;  %v1063_v36 = vadd.f32 %v1047_v32, %v967_v22 }
 0x21b   : > { %vm1030_vm15 = vcmp.eq.s32.totalorder %v1008_v24, %v2646_v53 }
 0x21c   : > { %v1046_v31 = vsel %vm1030_vm15, 1.0, %v2333_v56  ;;  %v1079_v51 = vmul.f32 0.125, %v1063_v36 }
 0x21d   : > { %v1062_v23 = vadd.f32 %v1046_v31, %v966_v12 }
 0x21f   : > { %v1078_v52 = vmul.f32 0.125, %v1062_v23  ;;  %v825_v60 = vpop.permute.xlu1 %824 }
 0x220   : > { %vm841_vm4 = vcmp.eq.s32.totalorder %v825_v60, %v2646_v53 }
 0x221   : > { %1994 = vmatprep.mubr.msk.f32.mxu1 %vm1097_vm12, %v1078_v52  ;;  %v857_v33 = vsel %vm841_vm4, 1.0, %v2333_v56 }
 0x222   : > { %1995 = vmatmul.mubr.msk.f32.gmra.mrb[4].mxu1 %vm1097_vm12, %v1079_v51  ;;  %v873_v63 = vadd.f32 %v857_v33, %v777_v19 }
 0x223   : > { %v1981_v55 = vpop.f32.mrb[2].mxu0 }
 0x224   : > { %v1222_v25 = vpop.f32.mrb[3].mxu0  ;;  %v918_v43 = vpop.permute.xlu1 %917  ;;  %v1228_v35 = vadd.f32 %v1981_v55, %v3251_v13 }
 0x225   : > { %vm936_vm3 = vcmp.eq.s32.totalorder %v918_v43, %v2646_v53  ;;  %v1223_v46 = vadd.f32 %v3251_v13, %v1222_v25 }
 0x226   : > { %v952_v27 = vsel %vm936_vm3, 1.0, %v2333_v56 }
 0x227   : > { %v968_v11 = vadd.f32 %v952_v27, %v872_v47  ;;  %v1293_v2 = vmax.f32 %v1223_v46, 0.0  ;;  %v1533_v47 = vld [vmem:[%s3419_s5 + $0x10] sm:$0xff] }
 0x228   : > { %v921_v5 = vpop.permute.xlu1 %920  ;;  %v2108_v34 = vpack.c.bf16 %v1534_v9, %v1533_v47 }
 0x229   : > { %v1064_v40 = vadd.f32 %v1048_v26, %v968_v11  ;;  %vm937_vm5 = vcmp.eq.s32.totalorder %v921_v5, %v2646_v53  ;;  %v3302_v11 = vld [vmem:[%s3418_s4] ss:$0 sm:$0xff] }
 0x22a   : > { %v953_v38 = vsel %vm937_vm5, 1.0, %v2333_v56  ;;  %2109 = vmatprep.subr.bf16.mxu0 %v2108_v34 }
 0x22b   : > { %v1080_v49 = vmul.f32 0.125, %v1064_v40  ;;  %v969_v15 = vadd.f32 %v953_v38, %v873_v63  ;;  %2111 = vmatpush3.bf16.msra.mxu0 %v2108_v34 }
 0x22d   : > { %1997 = vmatprep.mubr.msk.f32.mxu1 %vm1097_vm12, %v1080_v49  ;;  %v1017_v21 = vpop.permute.xlu1 %1016 }
 0x22e   : > { %vm1033_vm6 = vcmp.eq.s32.totalorder %v1017_v21, %v2646_v53  ;;  %v1294_v53 = vmax.f32 %v1228_v35, 0.0 }
 0x22f   : > { %v1049_v18 = vsel %vm1033_vm6, 1.0, %v2333_v56 }
 0x230   : > { %v1065_v50 = vadd.f32 %v1049_v18, %v969_v15 }
 0x232   : > { %v1081_v20 = vmul.f32 0.125, %v1065_v50 }
 0x234   : > { %1998 = vmatmul.mubr.msk.f32.gmra.mrb[6].mxu1 %vm1097_vm12, %v1081_v20 }
 0x235   : > { %2016 = vmatprep.mubr.msk.f32.mxu1 %vm1097_vm12, %v1291_v45 }
 0x238   : > { %2017 = vmatmul.mubr.msk.f32.vlgmr.msra.gmra.mrb[8].mxu1 %vm1097_vm12, %v1292_v41 }
 0x239   : > { %2019 = vmatprep.mubr.msk.f32.mxu1 %vm1097_vm12, %v1293_v2 }
 0x23c   : > { %2020 = vmatmul.mubr.msk.f32.gmra.mrb[10].mxu1 %vm1097_vm12, %v1294_v53 }
 0x255   : > { %v1984_v56 = vpop.f32.mrb[4].mxu0 }
 0x256   : > { %v1238_v30 = vadd.f32 %v1984_v56, %v3251_v13  ;;  %v1232_v59 = vpop.f32.mrb[5].mxu0 }
 0x257   : > { %v1233_v17 = vadd.f32 %v3251_v13, %v1232_v59 }
 0x258   : > { %v1296_v12 = vmax.f32 %v1238_v30, 0.0 }
 0x259   : > { %v1295_v6 = vmax.f32 %v1233_v17, 0.0 }
 0x25b   : > { %2022 = vmatprep.mubr.msk.f32.mxu1 %vm1097_vm12, %v1295_v6 }
 0x25c   : > { %2023 = vmatmul.mubr.msk.f32.gmra.mrb[12].mxu1 %vm1097_vm12, %v1296_v12 }
 0x279   : > { %v1987_v44 = vpop.f32.mrb[6].mxu0 }
 0x27a   : > { %v1248_v14 = vadd.f32 %v1987_v44, %v3251_v13  ;;  %v1242_v48 = vpop.f32.mrb[7].mxu0 }
 0x27b   : > { %v1243_v16 = vadd.f32 %v3251_v13, %v1242_v48 }
 0x27c   : > { %v1298_v61 = vmax.f32 %v1248_v14, 0.0 }
 0x27d   : > { %v1297_v39 = vmax.f32 %v1243_v16, 0.0 }
 0x27f   : > { %2025 = vmatprep.mubr.msk.f32.mxu1 %vm1097_vm12, %v1297_v39 }
 0x280   : > { %2026 = vmatmul.mubr.msk.f32.gmra.mrb[14].mxu1 %vm1097_vm12, %v1298_v61 }
 0x2be   : > { %v1990_v58 = vpop.f32.mrb[0].mxu1 }
 0x2bf   : > { %v1258_v0 = vadd.f32 %v1990_v58, %v3251_v13  ;;  %v1252_v29 = vpop.f32.mrb[1].mxu1 }
 0x2c0   : > { %v1253_v28 = vadd.f32 %v3251_v13, %v1252_v29 }
 0x2c1   : > { %v1300_v10 = vmax.f32 %v1258_v0, 0.0 }
 0x2c2   : > { %v1299_v54 = vmax.f32 %v1253_v28, 0.0 }
 0x2c4   : > { %2028 = vmatprep.mubr.msk.f32.mxu1 %vm1097_vm12, %v1299_v54 }
 0x2c5   : > { %2029 = vmatmul.mubr.msk.f32.gmra.mrb[16].mxu1 %vm1097_vm12, %v1300_v10 }
 0x2cb   : > { %v1993_v22 = vpop.f32.mrb[2].mxu1 }
 0x2cc   : > { %v1268_v24 = vadd.f32 %v1993_v22, %v3251_v13  ;;  %v1262_v32 = vpop.f32.mrb[3].mxu1 }
 0x2cd   : > { %v1263_v36 = vadd.f32 %v3251_v13, %v1262_v32 }
 0x2ce   : > { %v1302_v23 = vmax.f32 %v1268_v24, 0.0  ;;  %v1869_v24 = vld [vmem:[%s3420_s6] ss:$0 sm:$0xff] }
 0x2cf   : > { %v1301_v31 = vmax.f32 %v1263_v36, 0.0 }
 0x2d1   : > { %2031 = vmatprep.mubr.msk.f32.mxu1 %vm1097_vm12, %v1301_v31 }
 0x2d2   : > { %2032 = vmatmul.mubr.msk.f32.gmra.mrb[18].mxu1 %vm1097_vm12, %v1302_v23 }
 0x2f5   : > { %v1996_v52 = vpop.f32.mrb[4].mxu1 }
 0x2f6   : > { %v1278_v60 = vadd.f32 %v1996_v52, %v3251_v13  ;;  %v1272_v51 = vpop.f32.mrb[5].mxu1 }
 0x2f7   : > { %v1273_v4 = vadd.f32 %v3251_v13, %v1272_v51 }
 0x2f8   : > { %v1304_v25 = vmax.f32 %v1278_v60, 0.0 }
 0x2f9   : > { %v1303_v55 = vmax.f32 %v1273_v4, 0.0 }
 0x2fb   : > { %2034 = vmatprep.mubr.msk.f32.mxu1 %vm1097_vm12, %v1303_v55 }
 0x2fc   : > { %2035 = vmatmul.mubr.msk.f32.gmra.mrb[20].mxu1 %vm1097_vm12, %v1304_v25 }
 0x307   : > { %v1999_v43 = vpop.f32.mrb[6].mxu1 }
 0x308   : > { %v1288_v42 = vadd.f32 %v1999_v43, %v3251_v13  ;;  %v1282_v27 = vpop.f32.mrb[7].mxu1 }
 0x309   : > { %v1283_v8 = vadd.f32 %v3251_v13, %v1282_v27 }
 0x30a   : > { %v1306_v5 = vmax.f32 %v1288_v42, 0.0 }
 0x30b   : > { %v1305_v37 = vmax.f32 %v1283_v8, 0.0  ;;  %v2018_v26 = vpop.f32.mrb[8].mxu1 }
 0x30c   : > { %v1442_v33 = vadd.f32 %v2018_v26, %v3302_v11  ;;  %v1436_v40 = vpop.f32.mrb[9].mxu1 }
 0x30d   : > { %v1437_v19 = vadd.f32 %v3302_v11, %v1436_v40  ;;  %2037 = vmatprep.mubr.msk.f32.mxu1 %vm1097_vm12, %v1305_v37 }
 0x30e   : > { %2038 = vmatmul.mubr.msk.f32.gmra.mrb[22].mxu1 %vm1097_vm12, %v1306_v5  ;;  %v1516_v13 = vmax.f32 %v1442_v33, 0.0 }
 0x30f   : > { %v1515_v49 = vmax.f32 %v1437_v19, 0.0  ;;  %v2021_v38 = vpop.f32.mrb[10].mxu1 }
 0x310   : > { %v1452_v63 = vadd.f32 %v2021_v38, %v3302_v11  ;;  %v1446_v21 = vpop.f32.mrb[11].mxu1 }
 0x311   : > { %v1447_v15 = vadd.f32 %v3302_v11, %v1446_v21  ;;  %2048 = vmatprep.mubr.msk.f32.mxu0 %vm1542_vm7, %v1515_v49 }
 0x312   : > { %2049 = vmatmul.mubr.msk.f32.vlgmr.msra.gmra.mrb[8].mxu0 %vm1542_vm7, %v1516_v13  ;;  %v1518_v18 = vmax.f32 %v1452_v63, 0.0 }
 0x313   : > { %v1517_v1 = vmax.f32 %v1447_v15, 0.0 }
 0x315   : > { %2051 = vmatprep.mubr.msk.f32.mxu0 %vm1542_vm7, %v1517_v1 }
 0x316   : > { %2052 = vmatmul.mubr.msk.f32.gmra.mrb[10].mxu0 %vm1542_vm7, %v1518_v18 }
 0x32f   : > { %v2024_v50 = vpop.f32.mrb[12].mxu1 }
 0x330   : > { %v1462_v57 = vadd.f32 %v2024_v50, %v3302_v11  ;;  %v1456_v20 = vpop.f32.mrb[13].mxu1 }
 0x331   : > { %v1457_v45 = vadd.f32 %v3302_v11, %v1456_v20 }
 0x332   : > { %v1520_v41 = vmax.f32 %v1462_v57, 0.0 }
 0x333   : > { %v1519_v46 = vmax.f32 %v1457_v45, 0.0 }
 0x335   : > { %2054 = vmatprep.mubr.msk.f32.mxu0 %vm1542_vm7, %v1519_v46 }
 0x336   : > { %2055 = vmatmul.mubr.msk.f32.gmra.mrb[12].mxu0 %vm1542_vm7, %v1520_v41 }
 0x353   : > { %v2027_v35 = vpop.f32.mrb[14].mxu1 }
 0x354   : > { %v1472_v2 = vadd.f32 %v2027_v35, %v3302_v11  ;;  %v1466_v53 = vpop.f32.mrb[15].mxu1 }
 0x355   : > { %v1467_v56 = vadd.f32 %v3302_v11, %v1466_v53 }
 0x356   : > { %v1522_v59 = vmax.f32 %v1472_v2, 0.0 }
 0x357   : > { %v1521_v30 = vmax.f32 %v1467_v56, 0.0 }
 0x359   : > { %2057 = vmatprep.mubr.msk.f32.mxu0 %vm1542_vm7, %v1521_v30 }
 0x35a   : > { %2058 = vmatmul.mubr.msk.f32.gmra.mrb[14].mxu0 %vm1542_vm7, %v1522_v59 }
 0x398   : > { %v2030_v17 = vpop.f32.mrb[16].mxu1 }
 0x399   : > { %v1482_v6 = vadd.f32 %v2030_v17, %v3302_v11  ;;  %v1476_v12 = vpop.f32.mrb[17].mxu1 }
 0x39a   : > { %v1477_v44 = vadd.f32 %v3302_v11, %v1476_v12 }
 0x39b   : > { %v1524_v48 = vmax.f32 %v1482_v6, 0.0 }
 0x39c   : > { %v1523_v14 = vmax.f32 %v1477_v44, 0.0 }
 0x39e   : > { %2060 = vmatprep.mubr.msk.f32.mxu0 %vm1542_vm7, %v1523_v14 }
 0x39f   : > { %2061 = vmatmul.mubr.msk.f32.gmra.mrb[16].mxu0 %vm1542_vm7, %v1524_v48 }
 0x3a5   : > { %v2033_v16 = vpop.f32.mrb[18].mxu1 }
 0x3a6   : > { %v1492_v39 = vadd.f32 %v2033_v16, %v3302_v11  ;;  %v1486_v61 = vpop.f32.mrb[19].mxu1 }
 0x3a7   : > { %v1487_v62 = vadd.f32 %v3302_v11, %v1486_v61 }
 0x3a8   : > { %v1526_v3 = vmax.f32 %v1492_v39, 0.0 }
 0x3a9   : > { %v1525_v7 = vmax.f32 %v1487_v62, 0.0 }
 0x3ab   : > { %2063 = vmatprep.mubr.msk.f32.mxu0 %vm1542_vm7, %v1525_v7 }
 0x3ac   : > { %2064 = vmatmul.mubr.msk.f32.gmra.mrb[18].mxu0 %vm1542_vm7, %v1526_v3 }
 0x3cf   : > { %v2036_v47 = vpop.f32.mrb[20].mxu1 }
 0x3d0   : > { %v1502_v9 = vadd.f32 %v2036_v47, %v3302_v11  ;;  %v1496_v34 = vpop.f32.mrb[21].mxu1 }
 0x3d1   : > { %v1497_v58 = vadd.f32 %v3302_v11, %v1496_v34 }
 0x3d2   : > { %v1528_v29 = vmax.f32 %v1502_v9, 0.0 }
 0x3d3   : > { %v1527_v0 = vmax.f32 %v1497_v58, 0.0 }
 0x3d5   : > { %2066 = vmatprep.mubr.msk.f32.mxu0 %vm1542_vm7, %v1527_v0 }
 0x3d6   : > { %2067 = vmatmul.mubr.msk.f32.gmra.mrb[20].mxu0 %vm1542_vm7, %v1528_v29 }
 0x3e1   : > { %v2039_v28 = vpop.f32.mrb[22].mxu1 }
 0x3e2   : > { %v1512_v54 = vadd.f32 %v2039_v28, %v3302_v11  ;;  %v1506_v10 = vpop.f32.mrb[23].mxu1 }
 0x3e3   : > { %v1507_v22 = vadd.f32 %v3302_v11, %v1506_v10 }
 0x3e4   : > { %v1530_v31 = vmax.f32 %v1512_v54, 0.0 }
 0x3e5   : > { %v1529_v32 = vmax.f32 %v1507_v22, 0.0  ;;  %v2050_v36 = vpop.f32.mrb[8].mxu0 }
 0x3e6   : > { %v1663_v23 = vadd.f32 %v2050_v36, %v1869_v24  ;;  %v1657_v52 = vpop.f32.mrb[9].mxu0 }
 0x3e7   : > { %v1658_v60 = vadd.f32 %v1869_v24, %v1657_v52  ;;  %2069 = vmatprep.mubr.msk.f32.mxu0 %vm1542_vm7, %v1529_v32 }
 0x3e8   : > { %1737 = vst [vmem:[%s3343_s29 + $0x8] sm:$0xff] %v1663_v23  ;;  %2070 = vmatmul.mubr.msk.f32.gmra.mrb[22].mxu0 %vm1542_vm7, %v1530_v31 }
 0x3e9   : > { %1736 = vst [vmem:[%s3343_s29] sm:$0xff] %v1658_v60  ;;  %v2053_v51 = vpop.f32.mrb[10].mxu0 }
 0x3ea   : > { %v1673_v4 = vadd.f32 %v2053_v51, %v1869_v24  ;;  %v1667_v55 = vpop.f32.mrb[11].mxu0 }
 0x3eb   : > { %v1668_v25 = vadd.f32 %v1869_v24, %v1667_v55 }
 0x3ec   : > { %1739 = vst [vmem:[%s3343_s29 + $0x18] sm:$0xff] %v1673_v4 }
 0x3ed   : > { %1738 = vst [vmem:[%s3343_s29 + $0x10] sm:$0xff] %v1668_v25 }
 0x409   : > { %v2056_v43 = vpop.f32.mrb[12].mxu0 }
 0x40a   : > { %v1683_v42 = vadd.f32 %v2056_v43, %v1869_v24  ;;  %v1677_v27 = vpop.f32.mrb[13].mxu0 }
 0x40b   : > { %v1678_v8 = vadd.f32 %v1869_v24, %v1677_v27 }
 0x40c   : > { %1741 = vst [vmem:[%s3343_s29 + $0x28] sm:$0xff] %v1683_v42 }
 0x40d   : > { %1740 = vst [vmem:[%s3343_s29 + $0x20] sm:$0xff] %v1678_v8 }
 0x42d   : > { %v2059_v11 = vpop.f32.mrb[14].mxu0 }
 0x42e   : > { %v1693_v37 = vadd.f32 %v2059_v11, %v1869_v24  ;;  %v1687_v26 = vpop.f32.mrb[15].mxu0 }
 0x42f   : > { %v1688_v5 = vadd.f32 %v1869_v24, %v1687_v26 }
 0x430   : > { %1743 = vst [vmem:[%s3343_s29 + $0x38] sm:$0xff] %v1693_v37 }
 0x431   : > { %1742 = vst [vmem:[%s3343_s29 + $0x30] sm:$0xff] %v1688_v5 }
 0x472   : > { %v2062_v33 = vpop.f32.mrb[16].mxu0 }
 0x473   : > { %v1703_v40 = vadd.f32 %v2062_v33, %v1869_v24  ;;  %v1697_v19 = vpop.f32.mrb[17].mxu0 }
 0x474   : > { %v1698_v49 = vadd.f32 %v1869_v24, %v1697_v19 }
 0x475   : > { %1745 = vst [vmem:[%s3343_s29 + $0x48] sm:$0xff] %v1703_v40 }
 0x476   : > { %1744 = vst [vmem:[%s3343_s29 + $0x40] sm:$0xff] %v1698_v49 }
 0x47f   : > { %v2065_v38 = vpop.f32.mrb[18].mxu0 }
 0x480   : > { %v1713_v13 = vadd.f32 %v2065_v38, %v1869_v24  ;;  %v1707_v63 = vpop.f32.mrb[19].mxu0 }
 0x481   : > { %v1708_v21 = vadd.f32 %v1869_v24, %v1707_v63 }
 0x482   : > { %1747 = vst [vmem:[%s3343_s29 + $0x58] sm:$0xff] %v1713_v13 }
 0x483   : > { %1746 = vst [vmem:[%s3343_s29 + $0x50] sm:$0xff] %v1708_v21 }
 0x4a9   : > { %v2068_v15 = vpop.f32.mrb[20].mxu0 }
 0x4aa   : > { %v1723_v1 = vadd.f32 %v2068_v15, %v1869_v24  ;;  %v1717_v18 = vpop.f32.mrb[21].mxu0 }
 0x4ab   : > { %v1718_v50 = vadd.f32 %v1869_v24, %v1717_v18 }
 0x4ac   : > { %1749 = vst [vmem:[%s3343_s29 + $0x68] sm:$0xff] %v1723_v1 }
 0x4ad   : > { %1748 = vst [vmem:[%s3343_s29 + $0x60] sm:$0xff] %v1718_v50 }
 0x4bb   : > { %v2071_v57 = vpop.f32.mrb[22].mxu0 }
 0x4bc   : > { %v1733_v20 = vadd.f32 %v2071_v57, %v1869_v24  ;;  %v1727_v45 = vpop.f32.mrb[23].mxu0 }
 0x4bd   : > { %v1728_v46 = vadd.f32 %v1869_v24, %v1727_v45 }
 0x4be   : > { %1751 = vst [vmem:[%s3343_s29 + $0x78] sm:$0xff] %v1733_v20 }
 0x4bf   : > { %1750 = vst [vmem:[%s3343_s29 + $0x70] sm:$0xff] %v1728_v46 }
 0x4c0   : > { %2274 = shalt.err (!%p2271_p3)
}
 0x4c1   : > { %s2275_s17 = scalar_lea.hbm %s3365_s15, 2048  ;;  %s2279_s23 = scalar_lea.hbm %s3421_s7, 4096 }
 0x4c2   : > { %p2276_p4 = scmp.ne.s32.totalorder %s3365_s15, %s2275_s17  ;;  %p2280_p9 = scmp.lt.u32.totalorder %s3365_s15, %s3421_s7 }
 0x4c3   : > { %p2281_p10 = scmp.lt.u32.totalorder %s2279_s23, %s2275_s17  ;;  %p2283_p12 = scmp.lt.u32.totalorder %s2275_s17, %s3365_s15 }
 0x4c4   : > { %p2277_p7 = pnand %p2276_p4, %p2415_p5 }
 0x4c5   : > { %p2282_p11 = por %p2281_p10, %p2280_p9 }
 0x4c6   : > { %p2278_p8 = pneg %p2277_p7 }
 0x4c7   : > { %p2284_p13 = por %p2283_p12, %p2282_p11 }
 0x4c9   : > { %p2285_p0 = pnand %p2284_p13, %p2278_p8 }
 0x4cb   : > { %2288 = shalt.err (!%p2285_p0)
}
 0x4cc   : > { %s2335_s13 = smov 128   ;;  %s2336_s14 = smov 8  }
 0x4cd   : > { %2120 = dma.vmem_to_hbm [thread:$0]  (%p2415_p5), %s3367_s9, 2048, %s3365_s15, %s3373_s16, %s2335_s13, %s2335_s13, %s2336_s14  }
 0x4ce PF: > { %p2126_p1 = scmp.ge.s32.totalorder %s2323_s27, 2  ;;  %s1781_s28 = sand.u32 1, %s2311_s24  }
 0x4cf   : > { %s1782_s18 = scalar_lea.sflag [#allocation3], %s1781_s28 }
 0x4d0   : > { %p2123_p2 = pnand %p2126_p1, %p2419_p6 }
 0x4d2   : > { %2306 = dma.done.wait (!%p2123_p2), %s1782_s18, 2048  }
 0x4d3   : > { %2308 = vsyncadd (!%p2123_p2), %s1782_s18, 4294965248  ;;  %p17_p3 = scmp.ge.s32.totalorder %s2402_s30, 4   ;;  %s3453_s24 = smov %s2315_s25 }
 0x4d4   : > { %s3454_s25 = smov %s2319_s26  ;;  %s3455_s26 = smov %s2413_s10 }
 0x4d5   : > { %s3456_s27 = smov %s2402_s30  ;;  %19 = sbr.rel (!%p17_p3) target bundleno = 3 (0x3), region = 83 }
 0x4dc   :  { %1787 = vsyncpa [#allocation3], 1 }
 0x4dd   :  { %1789 = vsyncpa [#allocation3 + $0x1], 1 }

</bundles_post_ra>
